<compile_context>
chip_gen: v7x
topology: tpu7x:2x2x1
jax: 0.10.0
libtpu: 0.0.40
codegen_flags: <defaults>
</compile_context>

<pallas_src>
import functools

import jax
import jax.numpy as jnp
from jax.experimental import pallas as pl
from jax.experimental.pallas import tpu as pltpu


def _vmem_limit_bytes():
    """Generation-dependent scoped-VMEM limit: v5e/v6e have 128 MiB physical,
    v7x only 64 MiB."""
    try:
        cap = getattr(pltpu.get_tpu_info(), "vmem_capacity_bytes", 0)
    except Exception:
        cap = 0
    if cap and cap > 80 * 1024 * 1024:       # v5e / v6e (128 MiB physical)
        return 100 * 1024 * 1024
    return 48 * 1024 * 1024                  # v7x (64 MiB physical) / unknown


_VMEM_LIMIT = _vmem_limit_bytes()


def _cparams(dimension_semantics):
    return pltpu.CompilerParams(
        dimension_semantics=dimension_semantics,
        vmem_limit_bytes=_VMEM_LIMIT)


def _row_tile(m, max_tile=512):
    """Largest tile from a fixed menu (<= max_tile) that divides m."""
    for t in (1024, 512, 256, 128, 64, 32, 16, 8):
        if t <= max_tile and m % t == 0:
            return t
    return m


def _gelu(x):
    # tanh approximation of BERT's erf GELU (f32 math).
    # TODO(synk): exact erf GELU not used (no guaranteed erf lowering in Mosaic).
    return 0.5 * x * (1.0 + jnp.tanh(0.7978845608028654 * (x + 0.044715 * x * x * x)))


def _layernorm(x, g, b, eps=1e-12):
    mu = jnp.mean(x, axis=-1, keepdims=True)
    xc = x - mu
    var = jnp.mean(xc * xc, axis=-1, keepdims=True)
    return xc * jax.lax.rsqrt(var + eps) * g + b


# ---------------------------------------------------------------------------
# Pallas kernels
# ---------------------------------------------------------------------------

def _layernorm_kernel(x_ref, g_ref, b_ref, o_ref):
    o_ref[...] = _layernorm(x_ref[...], g_ref[...], b_ref[...])


def layernorm(x, gamma, beta):
    M, H = x.shape
    tm = _row_tile(M, max_tile=1024)
    return pl.pallas_call(
        _layernorm_kernel,
        out_shape=jax.ShapeDtypeStruct((M, H), jnp.float32),
        grid=(M // tm,),
        in_specs=[pl.BlockSpec((tm, H), lambda i: (i, 0)),
                  pl.BlockSpec((1, H), lambda i: (0, 0)),
                  pl.BlockSpec((1, H), lambda i: (0, 0))],
        out_specs=pl.BlockSpec((tm, H), lambda i: (i, 0)),
        compiler_params=_cparams(("parallel",)),
    )(x, gamma.reshape(1, H), beta.reshape(1, H))


def _attn_kernel(xq_ref, xf_ref, mask_ref, wq_ref, bq_ref, wkv_ref, bkv_ref,
                 wo_ref, bo_ref, g_ref, b_ref, o_ref, kv_scr, ctx_scr,
                 *, heads, scale):
    """Fused QKV projection + multi-head attention + output projection +
    residual + LayerNorm for one (batch, query-tile) grid step."""
    S = xf_ref.shape[1]
    H = xf_ref.shape[2]
    Dh = H // heads

    # K/V projection for the whole sequence, once per batch element
    # (query-tile axis is the inner, "arbitrary" grid axis).
    @pl.when(pl.program_id(1) == 0)
    def _():
        kv = jnp.dot(xf_ref[0].astype(jnp.bfloat16), wkv_ref[...],
                     preferred_element_type=jnp.float32) + bkv_ref[...]
        kv_scr[...] = kv.astype(jnp.bfloat16)

    xq = xq_ref[0]                                        # [tq, H] f32 residual
    q = (jnp.dot(xq.astype(jnp.bfloat16), wq_ref[...],
                 preferred_element_type=jnp.float32) + bq_ref[...]
         ).astype(jnp.bfloat16)                           # [tq, H]

    bias = (1.0 - mask_ref[0]) * -10000.0                 # [1, S], hoisted

    for h in range(heads):                                # static unroll
        qh = q[:, h * Dh:(h + 1) * Dh]                    # [tq, Dh] bf16
        kh = kv_scr[:, h * Dh:(h + 1) * Dh]               # [S, Dh]  bf16
        vh = kv_scr[:, H + h * Dh:H + (h + 1) * Dh]       # [S, Dh]  bf16
        s = jax.lax.dot_general(qh, kh, (((1,), (1,)), ((), ())),
                                preferred_element_type=jnp.float32)
        s = s * scale + bias
        s = s - jnp.max(s, axis=-1, keepdims=True)        # stable softmax (f32)
        p = jnp.exp(s)
        p = p * pl.reciprocal(jnp.sum(p, axis=-1, keepdims=True), approx=True)
        # TODO(synk): attention-prob dropout skipped (eval mode).
        ctx_scr[:, h * Dh:(h + 1) * Dh] = jnp.dot(
            p.astype(jnp.bfloat16), vh, preferred_element_type=jnp.float32)

    # Single full-depth output projection (K = H) + residual + LayerNorm.
    out = jnp.dot(ctx_scr[...].astype(jnp.bfloat16), wo_ref[...],
                  preferred_element_type=jnp.float32) + bo_ref[...] + xq
    # TODO(synk): hidden dropout before the residual LayerNorm skipped (eval mode).
    o_ref[0] = _layernorm(out, g_ref[...], b_ref[...])


def attention_block(x, mask, wq, bq, wkv, bkv, wo, bo, gamma, beta, heads):
    """x: [B,S,H] f32, mask: [B,S] (1/0).  QKV + attention + out-proj +
    residual + LayerNorm, grid = (B, S//tq)."""
    B, S, H = x.shape
    Dh = H // heads
    tq = _row_tile(S, max_tile=256)
    mask3 = mask.reshape(B, 1, S)
    return pl.pallas_call(
        functools.partial(_attn_kernel, heads=heads,
                          scale=1.0 / float(Dh) ** 0.5),
        out_shape=jax.ShapeDtypeStruct((B, S, H), jnp.float32),
        grid=(B, S // tq),
        in_specs=[pl.BlockSpec((1, tq, H), lambda b, q: (b, q, 0)),   # x (query tile)
                  pl.BlockSpec((1, S, H), lambda b, q: (b, 0, 0)),    # x (full, for K/V)
                  pl.BlockSpec((1, 1, S), lambda b, q: (b, 0, 0)),    # mask
                  pl.BlockSpec((H, H), lambda b, q: (0, 0)),          # wq   (bf16)
                  pl.BlockSpec((1, H), lambda b, q: (0, 0)),          # bq
                  pl.BlockSpec((H, 2 * H), lambda b, q: (0, 0)),      # wkv  (bf16)
                  pl.BlockSpec((1, 2 * H), lambda b, q: (0, 0)),      # bkv
                  pl.BlockSpec((H, H), lambda b, q: (0, 0)),          # wo   (bf16)
                  pl.BlockSpec((1, H), lambda b, q: (0, 0)),          # bo
                  pl.BlockSpec((1, H), lambda b, q: (0, 0)),          # ln gamma
                  pl.BlockSpec((1, H), lambda b, q: (0, 0))],         # ln beta
        out_specs=pl.BlockSpec((1, tq, H), lambda b, q: (b, q, 0)),
        scratch_shapes=[pltpu.VMEM((S, 2 * H), jnp.bfloat16),   # persistent K/V
                        pltpu.VMEM((tq, H), jnp.float32)],      # merged-head ctx
        compiler_params=_cparams(("parallel", "arbitrary")),
    )(x, x, mask3, wq, bq.reshape(1, H), wkv, bkv.reshape(1, 2 * H),
      wo, bo.reshape(1, H), gamma.reshape(1, H), beta.reshape(1, H))


def _ffn_kernel(x_ref, wi_ref, bi_ref, wo_ref, bo_ref, g_ref, b_ref, o_ref):
    x = x_ref[...]
    inter = jnp.dot(x.astype(jnp.bfloat16), wi_ref[...],
                    preferred_element_type=jnp.float32) + bi_ref[...]
    inter = _gelu(inter)                                  # f32 transcendental math
    out = jnp.dot(inter.astype(jnp.bfloat16), wo_ref[...],
                  preferred_element_type=jnp.float32) + bo_ref[...]
    # TODO(synk): hidden dropout before the residual LayerNorm skipped (eval mode).
    o_ref[...] = _layernorm(out + x, g_ref[...], b_ref[...])


def ffn_block(x, wi, bi, wo2, bo2, gamma, beta):
    """Fused FFN: GELU(x@wi+bi)@wo2+bo2, residual add, LayerNorm.  Grid over M."""
    M, H = x.shape
    I = wi.shape[1]
    tm = _row_tile(M, max_tile=512)
    return pl.pallas_call(
        _ffn_kernel,
        out_shape=jax.ShapeDtypeStruct((M, H), jnp.float32),
        grid=(M // tm,),
        in_specs=[pl.BlockSpec((tm, H), lambda i: (i, 0)),
                  pl.BlockSpec((H, I), lambda i: (0, 0)),      # wi  (bf16)
                  pl.BlockSpec((1, I), lambda i: (0, 0)),
                  pl.BlockSpec((I, H), lambda i: (0, 0)),      # wo2 (bf16)
                  pl.BlockSpec((1, H), lambda i: (0, 0)),
                  pl.BlockSpec((1, H), lambda i: (0, 0)),
                  pl.BlockSpec((1, H), lambda i: (0, 0))],
        out_specs=pl.BlockSpec((tm, H), lambda i: (i, 0)),
        compiler_params=_cparams(("parallel",)),
    )(x, wi, bi.reshape(1, I), wo2, bo2.reshape(1, H),
      gamma.reshape(1, H), beta.reshape(1, H))


def _head_kernel(x_ref, wp_ref, bp_ref, wr_ref, br_ref, wc_ref, bc_ref, t_ref,
                 y_ref, loss_ref):
    # pooler: tanh(Linear(hidden[:, 0]))  -- bf16 MXU operands, f32 accumulate
    pooled = jnp.tanh(jnp.dot(x_ref[...].astype(jnp.bfloat16), wp_ref[...],
                              preferred_element_type=jnp.float32) + bp_ref[...])
    # dim_reduction -> dropout(identity) -> classifier
    red = jnp.dot(pooled.astype(jnp.bfloat16), wr_ref[...],
                  preferred_element_type=jnp.float32) + br_ref[...]
    # TODO(synk): nn.Dropout is identity here (eval mode); training dropout is stochastic.
    y = jnp.dot(red.astype(jnp.bfloat16), wc_ref[...],
                preferred_element_type=jnp.float32) + bc_ref[...]
    y_ref[...] = y
    t = t_ref[...]
    # binary_cross_entropy_with_logits, mean reduction (numerically stable form)
    l = jnp.maximum(y, 0.0) - y * t + jnp.log1p(jnp.exp(-jnp.abs(y)))
    loss_ref[...] = jnp.mean(l, keepdims=True)


def head_and_loss(first_tok, wp, bp, wr, br, wc, bc, target):
    B, H = first_tok.shape
    F_ = wr.shape[1]
    Y = wc.shape[1]
    vmem = pl.BlockSpec(memory_space=pltpu.MemorySpace.VMEM)
    logits, loss = pl.pallas_call(
        _head_kernel,
        out_shape=(jax.ShapeDtypeStruct((B, Y), jnp.float32),
                   jax.ShapeDtypeStruct((1, 1), jnp.float32)),
        in_specs=[vmem] * 8,
        out_specs=(vmem, vmem),
    )(first_tok, wp, bp.reshape(1, H), wr, br.reshape(1, F_),
      wc, bc.reshape(1, Y), target)
    return logits, loss[0, 0]


# ---------------------------------------------------------------------------
# Model glue (embedding gathers / reshapes / parameter plumbing in plain JAX)
# ---------------------------------------------------------------------------

def bert_seq_cls_forward(params, input_ids, token_type_ids, attention_mask, target, cfg):
    B, S = input_ids.shape
    H = cfg["hidden"]
    Hn = cfg["heads"]

    # --- embeddings (table gathers stay in host JAX; LayerNorm runs in-kernel) ---
    pos_ids = jnp.arange(S)[None, :]
    emb = (params["word_emb"][input_ids]
           + params["pos_emb"][pos_ids]
           + params["type_emb"][token_type_ids]).astype(jnp.float32)
    h = layernorm(emb.reshape(B * S, H), params["emb_ln_g"], params["emb_ln_b"])
    # TODO(synk): embedding dropout skipped (eval mode).

    mask_f = attention_mask.astype(jnp.float32)           # [B, S]; bias built in-kernel

    # --- transformer encoder layers ---
    for layer in params["layers"]:
        # fused QKV projection + attention + out-proj + residual + LayerNorm
        h = attention_block(h.reshape(B, S, H), mask_f,
                            layer["wq"], layer["bq"], layer["wkv"], layer["bkv"],
                            layer["wo"], layer["bo"],
                            layer["ln1_g"], layer["ln1_b"], Hn).reshape(B * S, H)
        # fused FFN + residual + LayerNorm (intermediate stays in VMEM)
        h = ffn_block(h, layer["wi"], layer["bi"], layer["wo2"], layer["bo2"],
                      layer["ln2_g"], layer["ln2_b"])

    # --- pooler + dim_reduction + dropout(id) + classifier + BCE loss (one kernel) ---
    first_tok = h.reshape(B, S, H)[:, 0, :]
    logits, loss = head_and_loss(first_tok, params["pool_w"], params["pool_b"],
                                 params["red_w"], params["red_b"],
                                 params["cls_w"], params["cls_b"], target)
    return logits, loss


# ---------------------------------------------------------------------------
# Deterministic parameter init (mirrors init_bert_weights: N(0, 0.02), zero
# bias, LayerNorm weight=1 / bias=0).  Matmul weights are stored in bf16
# (MXU operand dtype); biases / LayerNorm params / embeddings stay f32.
# ---------------------------------------------------------------------------

def init_params(key, cfg, num_filter_maps, Y):
    std = 0.02
    keys = iter(jax.random.split(key, 128))

    def normal(shape, dtype=jnp.float32):
        return (std * jax.random.normal(next(keys), shape, jnp.float32)).astype(dtype)

    H = cfg["hidden"]
    I = cfg["intermediate"]
    bf = jnp.bfloat16
    params = dict(
        word_emb=normal((cfg["vocab"], H)),
        pos_emb=normal((cfg["max_pos"], H)),
        type_emb=normal((cfg["type_vocab"], H)),
        emb_ln_g=jnp.ones((H,), jnp.float32),
        emb_ln_b=jnp.zeros((H,), jnp.float32),
        pool_w=normal((H, H), bf),
        pool_b=jnp.zeros((H,), jnp.float32),
        red_w=normal((H, num_filter_maps), bf),
        red_b=jnp.zeros((num_filter_maps,), jnp.float32),
        cls_w=normal((num_filter_maps, Y), bf),
        cls_b=jnp.zeros((Y,), jnp.float32),
        layers=[],
    )
    for _ in range(cfg["layers"]):
        params["layers"].append(dict(
            wq=normal((H, H), bf), bq=jnp.zeros((H,), jnp.float32),
            wkv=normal((H, 2 * H), bf), bkv=jnp.zeros((2 * H,), jnp.float32),
            wo=normal((H, H), bf), bo=jnp.zeros((H,), jnp.float32),
            ln1_g=jnp.ones((H,), jnp.float32), ln1_b=jnp.zeros((H,), jnp.float32),
            wi=normal((H, I), bf), bi=jnp.zeros((I,), jnp.float32),
            wo2=normal((I, H), bf), bo2=jnp.zeros((H,), jnp.float32),
            ln2_g=jnp.ones((H,), jnp.float32), ln2_b=jnp.zeros((H,), jnp.float32),
        ))
    return params


if __name__ == "__main__":
    cfg = dict(vocab=100, hidden=32, heads=2, intermediate=64,
               layers=2, max_pos=16, type_vocab=2)
    B, S = 2, 8
    num_filter_maps, Y = 16, 5

    key = jax.random.PRNGKey(0)
    k_ids, k_types, k_tgt, k_params = jax.random.split(key, 4)

    input_ids = jax.random.randint(k_ids, (B, S), 0, cfg["vocab"])
    token_type_ids = jax.random.randint(k_types, (B, S), 0, cfg["type_vocab"])
    attention_mask = jnp.ones((B, S), jnp.int32).at[1, 6:].set(0)  # pad last 2 of batch 1
    target = jax.random.bernoulli(k_tgt, 0.3, (B, Y)).astype(jnp.float32)

    params = init_params(k_params, cfg, num_filter_maps, Y)

    fwd = jax.jit(functools.partial(bert_seq_cls_forward, cfg=cfg))
    logits, loss = fwd(params, input_ids, token_type_ids, attention_mask, target)
    jax.block_until_ready((logits, loss))
    assert logits.shape == (B, Y) and loss.shape == ()
    assert bool(jnp.isfinite(loss))
    print("KERNEL_OK")
</pallas_src>

<mosaic_0001>
module attributes {stable_mosaic.version = 11 : i64} {
  func.func @_layernorm_kernel(%arg0: i32, %arg1: memref<16x32xf32, #tpu.memory_space<vmem>>, %arg2: memref<1x32xf32, #tpu.memory_space<vmem>>, %arg3: memref<1x32xf32, #tpu.memory_space<vmem>>, %arg4: memref<16x32xf32, #tpu.memory_space<vmem>>) attributes {dimension_semantics = [#tpu.dimension_semantics<parallel>], iteration_bounds = array<i64: 1>, scalar_prefetch = 0 : i64, scratch_operands = 0 : i64, tpu.core_type = #tpu.core_type<tc>, window_params = [{transform_indices = @transform_0, window_bounds = array<i64: 16, 32>}, {pipeline_mode = #tpu.pipeline_mode<synchronous>, transform_indices = @transform_1, window_bounds = array<i64: 1, 32>}, {pipeline_mode = #tpu.pipeline_mode<synchronous>, transform_indices = @transform_2, window_bounds = array<i64: 1, 32>}, {transform_indices = @transform_3, window_bounds = array<i64: 16, 32>}]} {
    %c0 = arith.constant 0 : index
    %c0_0 = arith.constant 0 : index
    %0 = vector.load %arg1[%c0, %c0_0] : memref<16x32xf32, #tpu.memory_space<vmem>>, vector<16x32xf32>
    %c0_1 = arith.constant 0 : index
    %c0_2 = arith.constant 0 : index
    %1 = vector.load %arg2[%c0_1, %c0_2] : memref<1x32xf32, #tpu.memory_space<vmem>>, vector<1x32xf32>
    %c0_3 = arith.constant 0 : index
    %c0_4 = arith.constant 0 : index
    %2 = vector.load %arg3[%c0_3, %c0_4] : memref<1x32xf32, #tpu.memory_space<vmem>>, vector<1x32xf32>
    %cst = arith.constant dense<0.000000e+00> : vector<16xf32>
    %3 = vector.multi_reduction <add>, %0, %cst [1] : vector<16x32xf32> to vector<16xf32>
    %4 = vector.shape_cast %3 : vector<16xf32> to vector<16x1xf32>
    %cst_5 = arith.constant 3.200000e+01 : f32
    %5 = vector.broadcast %cst_5 : f32 to vector<16x1xf32>
    %6 = arith.divf %4, %5 : vector<16x1xf32>
    %7 = vector.broadcast %6 : vector<16x1xf32> to vector<16x32xf32>
    %8 = arith.subf %0, %7 : vector<16x32xf32>
    %9 = arith.mulf %8, %8 : vector<16x32xf32>
    %cst_6 = arith.constant dense<0.000000e+00> : vector<16xf32>
    %10 = vector.multi_reduction <add>, %9, %cst_6 [1] : vector<16x32xf32> to vector<16xf32>
    %11 = vector.shape_cast %10 : vector<16xf32> to vector<16x1xf32>
    %cst_7 = arith.constant 3.200000e+01 : f32
    %12 = vector.broadcast %cst_7 : f32 to vector<16x1xf32>
    %13 = arith.divf %11, %12 : vector<16x1xf32>
    %cst_8 = arith.constant 9.99999996E-13 : f32
    %14 = vector.broadcast %cst_8 : f32 to vector<16x1xf32>
    %15 = arith.addf %13, %14 : vector<16x1xf32>
    %16 = math.rsqrt %15 : vector<16x1xf32>
    %17 = vector.broadcast %16 : vector<16x1xf32> to vector<16x32xf32>
    %18 = arith.mulf %8, %17 : vector<16x32xf32>
    %19 = vector.broadcast %1 : vector<1x32xf32> to vector<16x32xf32>
    %20 = arith.mulf %18, %19 : vector<16x32xf32>
    %21 = vector.broadcast %2 : vector<1x32xf32> to vector<16x32xf32>
    %22 = arith.addf %20, %21 : vector<16x32xf32>
    %c0_9 = arith.constant 0 : index
    %c0_10 = arith.constant 0 : index
    %23 = vector.load %arg4[%c0_9, %c0_10] : memref<16x32xf32, #tpu.memory_space<vmem>>, vector<16x32xf32>
    tpu.vector_store %arg4[%c0_9, %c0_10], %22 {strides = array<i32>} : memref<16x32xf32, #tpu.memory_space<vmem>>, vector<16x32xf32>,
    return
  }
  func.func @transform_0(%arg0: i32) -> (i32, i32) {
    %c0_i32 = arith.constant 0 : i32
    %c0_i32_0 = arith.constant 0 : i32
    return %arg0, %c0_i32 : i32, i32
  }
  func.func @transform_1(%arg0: i32) -> (i32, i32) {
    %c0_i32 = arith.constant 0 : i32
    %c0_i32_0 = arith.constant 0 : i32
    %c0_i32_1 = arith.constant 0 : i32
    return %c0_i32, %c0_i32_0 : i32, i32
  }
  func.func @transform_2(%arg0: i32) -> (i32, i32) {
    %c0_i32 = arith.constant 0 : i32
    %c0_i32_0 = arith.constant 0 : i32
    %c0_i32_1 = arith.constant 0 : i32
    return %c0_i32, %c0_i32_0 : i32, i32
  }
  func.func @transform_3(%arg0: i32) -> (i32, i32) {
    %c0_i32 = arith.constant 0 : i32
    %c0_i32_0 = arith.constant 0 : i32
    return %arg0, %c0_i32 : i32, i32
  }
}

module attributes {stable_mosaic.version = 11 : i64} {
  func.func @_attn_kernel(%arg0: i32, %arg1: i32, %arg2: memref<1x8x32xf32, #tpu.memory_space<vmem>>, %arg3: memref<1x8x32xf32, #tpu.memory_space<vmem>>, %arg4: memref<1x1x8xf32, #tpu.memory_space<vmem>>, %arg5: memref<32x32xbf16, #tpu.memory_space<vmem>>, %arg6: memref<1x32xf32, #tpu.memory_space<vmem>>, %arg7: memref<32x64xbf16, #tpu.memory_space<vmem>>, %arg8: memref<1x64xf32, #tpu.memory_space<vmem>>, %arg9: memref<32x32xbf16, #tpu.memory_space<vmem>>, %arg10: memref<1x32xf32, #tpu.memory_space<vmem>>, %arg11: memref<1x32xf32, #tpu.memory_space<vmem>>, %arg12: memref<1x32xf32, #tpu.memory_space<vmem>>, %arg13: memref<1x8x32xf32, #tpu.memory_space<vmem>>, %arg14: memref<8x64xbf16, #tpu.memory_space<vmem>>, %arg15: memref<8x32xf32, #tpu.memory_space<vmem>>) attributes {dimension_semantics = [#tpu.dimension_semantics<parallel>, #tpu.dimension_semantics<arbitrary>], iteration_bounds = array<i64: 2, 1>, scalar_prefetch = 0 : i64, scratch_operands = 2 : i64, tpu.core_type = #tpu.core_type<tc>, window_params = [{transform_indices = @transform_0, window_bounds = array<i64: 1, 8, 32>}, {transform_indices = @transform_1, window_bounds = array<i64: 1, 8, 32>}, {transform_indices = @transform_2, window_bounds = array<i64: 1, 1, 8>}, {pipeline_mode = #tpu.pipeline_mode<synchronous>, transform_indices = @transform_3, window_bounds = array<i64: 32, 32>}, {pipeline_mode = #tpu.pipeline_mode<synchronous>, transform_indices = @transform_4, window_bounds = array<i64: 1, 32>}, {pipeline_mode = #tpu.pipeline_mode<synchronous>, transform_indices = @transform_5, window_bounds = array<i64: 32, 64>}, {pipeline_mode = #tpu.pipeline_mode<synchronous>, transform_indices = @transform_6, window_bounds = array<i64: 1, 64>}, {pipeline_mode = #tpu.pipeline_mode<synchronous>, transform_indices = @transform_7, window_bounds = array<i64: 32, 32>}, {pipeline_mode = #tpu.pipeline_mode<synchronous>, transform_indices = @transform_8, window_bounds = array<i64: 1, 32>}, {pipeline_mode = #tpu.pipeline_mode<synchronous>, transform_indices = @transform_9, window_bounds = array<i64: 1, 32>}, {pipeline_mode = #tpu.pipeline_mode<synchronous>, transform_indices = @transform_10, window_bounds = array<i64: 1, 32>}, {transform_indices = @transform_11, window_bounds = array<i64: 1, 8, 32>}]} {
    %c0_i32 = arith.constant 0 : i32
    %0 = arith.cmpi eq, %arg1, %c0_i32 : i32
    %1 = arith.extui %0 : i1 to i32
    %c0_i32_0 = arith.constant 0 : i32
    %2 = arith.cmpi ne, %1, %c0_i32_0 : i32
    scf.if %2 {
      %c0_50 = arith.constant 0 : index
      %c0_51 = arith.constant 0 : index
      %c0_52 = arith.constant 0 : index
      %93 = vector.load %arg3[%c0_50, %c0_51, %c0_52] : memref<1x8x32xf32, #tpu.memory_space<vmem>>, vector<1x8x32xf32>
      %94 = vector.shape_cast %93 : vector<1x8x32xf32> to vector<8x32xf32>
      %95 = arith.truncf %94 : vector<8x32xf32> to vector<8x32xbf16>
      %c0_53 = arith.constant 0 : index
      %c0_54 = arith.constant 0 : index
      %96 = vector.load %arg7[%c0_53, %c0_54] : memref<32x64xbf16, #tpu.memory_space<vmem>>, vector<32x64xbf16>
      %cst_55 = arith.constant dense<0.000000e+00> : vector<8x64xf32>
      %97 = tpu.matmul %95, %96, %cst_55 {dimension_numbers = #tpu.dot_dimension_numbers<[1], [0], [0], [1], [0, 0, 1, 1], [], []>} : vector<8x32xbf16>, vector<32x64xbf16>, vector<8x64xf32> -> vector<8x64xf32>
      %c0_56 = arith.constant 0 : index
      %c0_57 = arith.constant 0 : index
      %98 = vector.load %arg8[%c0_56, %c0_57] : memref<1x64xf32, #tpu.memory_space<vmem>>, vector<1x64xf32>
      %99 = vector.broadcast %98 : vector<1x64xf32> to vector<8x64xf32>
      %100 = arith.addf %97, %99 : vector<8x64xf32>
      %101 = arith.truncf %100 : vector<8x64xf32> to vector<8x64xbf16>
      %c0_58 = arith.constant 0 : index
      %c0_59 = arith.constant 0 : index
      %102 = vector.load %arg14[%c0_58, %c0_59] : memref<8x64xbf16, #tpu.memory_space<vmem>>, vector<8x64xbf16>
      tpu.vector_store %arg14[%c0_58, %c0_59], %101 {strides = array<i32>} : memref<8x64xbf16, #tpu.memory_space<vmem>>, vector<8x64xbf16>,
    } else {
    }
    %c0 = arith.constant 0 : index
    %c0_1 = arith.constant 0 : index
    %c0_2 = arith.constant 0 : index
    %3 = vector.load %arg2[%c0, %c0_1, %c0_2] : memref<1x8x32xf32, #tpu.memory_space<vmem>>, vector<1x8x32xf32>
    %4 = vector.shape_cast %3 : vector<1x8x32xf32> to vector<8x32xf32>
    %5 = arith.truncf %4 : vector<8x32xf32> to vector<8x32xbf16>
    %c0_3 = arith.constant 0 : index
    %c0_4 = arith.constant 0 : index
    %6 = vector.load %arg5[%c0_3, %c0_4] : memref<32x32xbf16, #tpu.memory_space<vmem>>, vector<32x32xbf16>
    %cst = arith.constant dense<0.000000e+00> : vector<8x32xf32>
    %7 = tpu.matmul %5, %6, %cst {dimension_numbers = #tpu.dot_dimension_numbers<[1], [0], [0], [1], [0, 0, 1, 1], [], []>} : vector<8x32xbf16>, vector<32x32xbf16>, vector<8x32xf32> -> vector<8x32xf32>
    %c0_5 = arith.constant 0 : index
    %c0_6 = arith.constant 0 : index
    %8 = vector.load %arg6[%c0_5, %c0_6] : memref<1x32xf32, #tpu.memory_space<vmem>>, vector<1x32xf32>
    %9 = vector.broadcast %8 : vector<1x32xf32> to vector<8x32xf32>
    %10 = arith.addf %7, %9 : vector<8x32xf32>
    %11 = arith.truncf %10 : vector<8x32xf32> to vector<8x32xbf16>
    %c0_7 = arith.constant 0 : index
    %c0_8 = arith.constant 0 : index
    %c0_9 = arith.constant 0 : index
    %12 = vector.load %arg4[%c0_7, %c0_8, %c0_9] : memref<1x1x8xf32, #tpu.memory_space<vmem>>, vector<1x1x8xf32>
    %13 = vector.shape_cast %12 : vector<1x1x8xf32> to vector<1x8xf32>
    %cst_10 = arith.constant 1.000000e+00 : f32
    %14 = vector.broadcast %cst_10 : f32 to vector<1x8xf32>
    %15 = arith.subf %14, %13 : vector<1x8xf32>
    %cst_11 = arith.constant -1.000000e+04 : f32
    %16 = vector.broadcast %cst_11 : f32 to vector<1x8xf32>
    %17 = arith.mulf %15, %16 : vector<1x8xf32>
    %18 = vector.extract_strided_slice %11 {offsets = [0, 0], sizes = [8, 16], strides = [1, 1]} : vector<8x32xbf16> to vector<8x16xbf16>
    %c0_12 = arith.constant 0 : index
    %c0_13 = arith.constant 0 : index
    %19 = vector.load %arg14[%c0_12, %c0_13] : memref<8x64xbf16, #tpu.memory_space<vmem>>, vector<8x16xbf16>
    %c0_14 = arith.constant 0 : index
    %c32 = arith.constant 32 : index
    %20 = vector.load %arg14[%c0_14, %c32] : memref<8x64xbf16, #tpu.memory_space<vmem>>, vector<8x16xbf16>
    %cst_15 = arith.constant dense<0.000000e+00> : vector<8x8xf32>
    %21 = tpu.matmul %18, %19, %cst_15 {dimension_numbers = #tpu.dot_dimension_numbers<[1], [1], [0], [0], [0, 0, 1, 0], [], []>} : vector<8x16xbf16>, vector<8x16xbf16>, vector<8x8xf32> -> vector<8x8xf32>
    %cst_16 = arith.constant 2.500000e-01 : f32
    %22 = vector.broadcast %cst_16 : f32 to vector<8x8xf32>
    %23 = arith.mulf %21, %22 : vector<8x8xf32>
    %24 = vector.broadcast %17 : vector<1x8xf32> to vector<8x8xf32>
    %25 = arith.addf %23, %24 : vector<8x8xf32>
    %cst_17 = arith.constant dense<0xFF800000> : vector<8xf32>
    %26 = vector.multi_reduction <maximumf>, %25, %cst_17 [1] : vector<8x8xf32> to vector<8xf32>
    %27 = vector.shape_cast %26 : vector<8xf32> to vector<8x1xf32>
    %28 = vector.broadcast %27 : vector<8x1xf32> to vector<8x8xf32>
    %29 = arith.subf %25, %28 : vector<8x8xf32>
    %30 = math.exp %29 : vector<8x8xf32>
    %cst_18 = arith.constant dense<0.000000e+00> : vector<8xf32>
    %31 = vector.multi_reduction <add>, %30, %cst_18 [1] : vector<8x8xf32> to vector<8xf32>
    %32 = vector.shape_cast %31 : vector<8xf32> to vector<8x1xf32>
    %33 = tpu.reciprocal %32 {approx = true} : vector<8x1xf32> -> vector<8x1xf32>
    %34 = vector.broadcast %33 : vector<8x1xf32> to vector<8x8xf32>
    %35 = arith.mulf %30, %34 : vector<8x8xf32>
    %36 = arith.truncf %35 : vector<8x8xf32> to vector<8x8xbf16>
    %cst_19 = arith.constant dense<0.000000e+00> : vector<8x16xf32>
    %37 = tpu.matmul %36, %20, %cst_19 {dimension_numbers = #tpu.dot_dimension_numbers<[1], [0], [0], [1], [0, 0, 1, 1], [], []>} : vector<8x8xbf16>, vector<8x16xbf16>, vector<8x16xf32> -> vector<8x16xf32>
    %c0_20 = arith.constant 0 : index
    %c0_21 = arith.constant 0 : index
    %38 = vector.load %arg15[%c0_20, %c0_21] : memref<8x32xf32, #tpu.memory_space<vmem>>, vector<8x16xf32>
    tpu.vector_store %arg15[%c0_20, %c0_21], %37 {strides = array<i32>} : memref<8x32xf32, #tpu.memory_space<vmem>>, vector<8x16xf32>,
    %39 = vector.extract_strided_slice %11 {offsets = [0, 16], sizes = [8, 16], strides = [1, 1]} : vector<8x32xbf16> to vector<8x16xbf16>
    %c0_22 = arith.constant 0 : index
    %c16 = arith.constant 16 : index
    %40 = vector.load %arg14[%c0_22, %c16] : memref<8x64xbf16, #tpu.memory_space<vmem>>, vector<8x16xbf16>
    %c0_23 = arith.constant 0 : index
    %c48 = arith.constant 48 : index
    %41 = vector.load %arg14[%c0_23, %c48] : memref<8x64xbf16, #tpu.memory_space<vmem>>, vector<8x16xbf16>
    %cst_24 = arith.constant dense<0.000000e+00> : vector<8x8xf32>
    %42 = tpu.matmul %39, %40, %cst_24 {dimension_numbers = #tpu.dot_dimension_numbers<[1], [1], [0], [0], [0, 0, 1, 0], [], []>} : vector<8x16xbf16>, vector<8x16xbf16>, vector<8x8xf32> -> vector<8x8xf32>
    %cst_25 = arith.constant 2.500000e-01 : f32
    %43 = vector.broadcast %cst_25 : f32 to vector<8x8xf32>
    %44 = arith.mulf %42, %43 : vector<8x8xf32>
    %45 = vector.broadcast %17 : vector<1x8xf32> to vector<8x8xf32>
    %46 = arith.addf %44, %45 : vector<8x8xf32>
    %cst_26 = arith.constant dense<0xFF800000> : vector<8xf32>
    %47 = vector.multi_reduction <maximumf>, %46, %cst_26 [1] : vector<8x8xf32> to vector<8xf32>
    %48 = vector.shape_cast %47 : vector<8xf32> to vector<8x1xf32>
    %49 = vector.broadcast %48 : vector<8x1xf32> to vector<8x8xf32>
    %50 = arith.subf %46, %49 : vector<8x8xf32>
    %51 = math.exp %50 : vector<8x8xf32>
    %cst_27 = arith.constant dense<0.000000e+00> : vector<8xf32>
    %52 = vector.multi_reduction <add>, %51, %cst_27 [1] : vector<8x8xf32> to vector<8xf32>
    %53 = vector.shape_cast %52 : vector<8xf32> to vector<8x1xf32>
    %54 = tpu.reciprocal %53 {approx = true} : vector<8x1xf32> -> vector<8x1xf32>
    %55 = vector.broadcast %54 : vector<8x1xf32> to vector<8x8xf32>
    %56 = arith.mulf %51, %55 : vector<8x8xf32>
    %57 = arith.truncf %56 : vector<8x8xf32> to vector<8x8xbf16>
    %cst_28 = arith.constant dense<0.000000e+00> : vector<8x16xf32>
    %58 = tpu.matmul %57, %41, %cst_28 {dimension_numbers = #tpu.dot_dimension_numbers<[1], [0], [0], [1], [0, 0, 1, 1], [], []>} : vector<8x8xbf16>, vector<8x16xbf16>, vector<8x16xf32> -> vector<8x16xf32>
    %c0_29 = arith.constant 0 : index
    %c16_30 = arith.constant 16 : index
    %59 = vector.load %arg15[%c0_29, %c16_30] : memref<8x32xf32, #tpu.memory_space<vmem>>, vector<8x16xf32>
    tpu.vector_store %arg15[%c0_29, %c16_30], %58 {strides = array<i32>} : memref<8x32xf32, #tpu.memory_space<vmem>>, vector<8x16xf32>,
    %c0_31 = arith.constant 0 : index
    %c0_32 = arith.constant 0 : index
    %60 = vector.load %arg15[%c0_31, %c0_32] : memref<8x32xf32, #tpu.memory_space<vmem>>, vector<8x32xf32>
    %61 = arith.truncf %60 : vector<8x32xf32> to vector<8x32xbf16>
    %c0_33 = arith.constant 0 : index
    %c0_34 = arith.constant 0 : index
    %62 = vector.load %arg9[%c0_33, %c0_34] : memref<32x32xbf16, #tpu.memory_space<vmem>>, vector<32x32xbf16>
    %cst_35 = arith.constant dense<0.000000e+00> : vector<8x32xf32>
    %63 = tpu.matmul %61, %62, %cst_35 {dimension_numbers = #tpu.dot_dimension_numbers<[1], [0], [0], [1], [0, 0, 1, 1], [], []>} : vector<8x32xbf16>, vector<32x32xbf16>, vector<8x32xf32> -> vector<8x32xf32>
    %c0_36 = arith.constant 0 : index
    %c0_37 = arith.constant 0 : index
    %64 = vector.load %arg10[%c0_36, %c0_37] : memref<1x32xf32, #tpu.memory_space<vmem>>, vector<1x32xf32>
    %65 = vector.broadcast %64 : vector<1x32xf32> to vector<8x32xf32>
    %66 = arith.addf %63, %65 : vector<8x32xf32>
    %67 = arith.addf %66, %4 : vector<8x32xf32>
    %c0_38 = arith.constant 0 : index
    %c0_39 = arith.constant 0 : index
    %68 = vector.load %arg11[%c0_38, %c0_39] : memref<1x32xf32, #tpu.memory_space<vmem>>, vector<1x32xf32>
    %c0_40 = arith.constant 0 : index
    %c0_41 = arith.constant 0 : index
    %69 = vector.load %arg12[%c0_40, %c0_41] : memref<1x32xf32, #tpu.memory_space<vmem>>, vector<1x32xf32>
    %cst_42 = arith.constant dense<0.000000e+00> : vector<8xf32>
    %70 = vector.multi_reduction <add>, %67, %cst_42 [1] : vector<8x32xf32> to vector<8xf32>
    %71 = vector.shape_cast %70 : vector<8xf32> to vector<8x1xf32>
    %cst_43 = arith.constant 3.200000e+01 : f32
    %72 = vector.broadcast %cst_43 : f32 to vector<8x1xf32>
    %73 = arith.divf %71, %72 : vector<8x1xf32>
    %74 = vector.broadcast %73 : vector<8x1xf32> to vector<8x32xf32>
    %75 = arith.subf %67, %74 : vector<8x32xf32>
    %76 = arith.mulf %75, %75 : vector<8x32xf32>
    %cst_44 = arith.constant dense<0.000000e+00> : vector<8xf32>
    %77 = vector.multi_reduction <add>, %76, %cst_44 [1] : vector<8x32xf32> to vector<8xf32>
    %78 = vector.shape_cast %77 : vector<8xf32> to vector<8x1xf32>
    %cst_45 = arith.constant 3.200000e+01 : f32
    %79 = vector.broadcast %cst_45 : f32 to vector<8x1xf32>
    %80 = arith.divf %78, %79 : vector<8x1xf32>
    %cst_46 = arith.constant 9.99999996E-13 : f32
    %81 = vector.broadcast %cst_46 : f32 to vector<8x1xf32>
    %82 = arith.addf %80, %81 : vector<8x1xf32>
    %83 = math.rsqrt %82 : vector<8x1xf32>
    %84 = vector.broadcast %83 : vector<8x1xf32> to vector<8x32xf32>
    %85 = arith.mulf %75, %84 : vector<8x32xf32>
    %86 = vector.broadcast %68 : vector<1x32xf32> to vector<8x32xf32>
    %87 = arith.mulf %85, %86 : vector<8x32xf32>
    %88 = vector.broadcast %69 : vector<1x32xf32> to vector<8x32xf32>
    %89 = arith.addf %87, %88 : vector<8x32xf32>
    %c0_47 = arith.constant 0 : index
    %c0_48 = arith.constant 0 : index
    %c0_49 = arith.constant 0 : index
    %90 = vector.load %arg13[%c0_47, %c0_48, %c0_49] : memref<1x8x32xf32, #tpu.memory_space<vmem>>, vector<1x8x32xf32>
    %91 = vector.shape_cast %90 : vector<1x8x32xf32> to vector<8x32xf32>
    %92 = vector.shape_cast %89 : vector<8x32xf32> to vector<1x8x32xf32>
    tpu.vector_store %arg13[%c0_47, %c0_48, %c0_49], %92 {strides = array<i32>} : memref<1x8x32xf32, #tpu.memory_space<vmem>>, vector<1x8x32xf32>,
    return
  }
  func.func @transform_0(%arg0: i32, %arg1: i32) -> (i32, i32, i32) {
    %c0_i32 = arith.constant 0 : i32
    %c0_i32_0 = arith.constant 0 : i32
    return %arg0, %arg1, %c0_i32 : i32, i32, i32
  }
  func.func @transform_1(%arg0: i32, %arg1: i32) -> (i32, i32, i32) {
    %c0_i32 = arith.constant 0 : i32
    %c0_i32_0 = arith.constant 0 : i32
    %c0_i32_1 = arith.constant 0 : i32
    return %arg0, %c0_i32, %c0_i32_0 : i32, i32, i32
  }
  func.func @transform_2(%arg0: i32, %arg1: i32) -> (i32, i32, i32) {
    %c0_i32 = arith.constant 0 : i32
    %c0_i32_0 = arith.constant 0 : i32
    %c0_i32_1 = arith.constant 0 : i32
    return %arg0, %c0_i32, %c0_i32_0 : i32, i32, i32
  }
  func.func @transform_3(%arg0: i32, %arg1: i32) -> (i32, i32) {
    %c0_i32 = arith.constant 0 : i32
    %c0_i32_0 = arith.constant 0 : i32
    %c0_i32_1 = arith.constant 0 : i32
    return %c0_i32, %c0_i32_0 : i32, i32
  }
  func.func @transform_4(%arg0: i32, %arg1: i32) -> (i32, i32) {
    %c0_i32 = arith.constant 0 : i32
    %c0_i32_0 = arith.constant 0 : i32
    %c0_i32_1 = arith.constant 0 : i32
    return %c0_i32, %c0_i32_0 : i32, i32
  }
  func.func @transform_5(%arg0: i32, %arg1: i32) -> (i32, i32) {
    %c0_i32 = arith.constant 0 : i32
    %c0_i32_0 = arith.constant 0 : i32
    %c0_i32_1 = arith.constant 0 : i32
    return %c0_i32, %c0_i32_0 : i32, i32
  }
  func.func @transform_6(%arg0: i32, %arg1: i32) -> (i32, i32) {
    %c0_i32 = arith.constant 0 : i32
    %c0_i32_0 = arith.constant 0 : i32
    %c0_i32_1 = arith.constant 0 : i32
    return %c0_i32, %c0_i32_0 : i32, i32
  }
  func.func @transform_7(%arg0: i32, %arg1: i32) -> (i32, i32) {
    %c0_i32 = arith.constant 0 : i32
    %c0_i32_0 = arith.constant 0 : i32
    %c0_i32_1 = arith.constant 0 : i32
    return %c0_i32, %c0_i32_0 : i32, i32
  }
  func.func @transform_8(%arg0: i32, %arg1: i32) -> (i32, i32) {
    %c0_i32 = arith.constant 0 : i32
    %c0_i32_0 = arith.constant 0 : i32
    %c0_i32_1 = arith.constant 0 : i32
    return %c0_i32, %c0_i32_0 : i32, i32
  }
  func.func @transform_9(%arg0: i32, %arg1: i32) -> (i32, i32) {
    %c0_i32 = arith.constant 0 : i32
    %c0_i32_0 = arith.constant 0 : i32
    %c0_i32_1 = arith.constant 0 : i32
    return %c0_i32, %c0_i32_0 : i32, i32
  }
  func.func @transform_10(%arg0: i32, %arg1: i32) -> (i32, i32) {
    %c0_i32 = arith.constant 0 : i32
    %c0_i32_0 = arith.constant 0 : i32
    %c0_i32_1 = arith.constant 0 : i32
    return %c0_i32, %c0_i32_0 : i32, i32
  }
  func.func @transform_11(%arg0: i32, %arg1: i32) -> (i32, i32, i32) {
    %c0_i32 = arith.constant 0 : i32
    %c0_i32_0 = arith.constant 0 : i32
    return %arg0, %arg1, %c0_i32 : i32, i32, i32
  }
}

module attributes {stable_mosaic.version = 11 : i64} {
  func.func @_ffn_kernel(%arg0: i32, %arg1: memref<16x32xf32, #tpu.memory_space<vmem>>, %arg2: memref<32x64xbf16, #tpu.memory_space<vmem>>, %arg3: memref<1x64xf32, #tpu.memory_space<vmem>>, %arg4: memref<64x32xbf16, #tpu.memory_space<vmem>>, %arg5: memref<1x32xf32, #tpu.memory_space<vmem>>, %arg6: memref<1x32xf32, #tpu.memory_space<vmem>>, %arg7: memref<1x32xf32, #tpu.memory_space<vmem>>, %arg8: memref<16x32xf32, #tpu.memory_space<vmem>>) attributes {dimension_semantics = [#tpu.dimension_semantics<parallel>], iteration_bounds = array<i64: 1>, scalar_prefetch = 0 : i64, scratch_operands = 0 : i64, tpu.core_type = #tpu.core_type<tc>, window_params = [{transform_indices = @transform_0, window_bounds = array<i64: 16, 32>}, {pipeline_mode = #tpu.pipeline_mode<synchronous>, transform_indices = @transform_1, window_bounds = array<i64: 32, 64>}, {pipeline_mode = #tpu.pipeline_mode<synchronous>, transform_indices = @transform_2, window_bounds = array<i64: 1, 64>}, {pipeline_mode = #tpu.pipeline_mode<synchronous>, transform_indices = @transform_3, window_bounds = array<i64: 64, 32>}, {pipeline_mode = #tpu.pipeline_mode<synchronous>, transform_indices = @transform_4, window_bounds = array<i64: 1, 32>}, {pipeline_mode = #tpu.pipeline_mode<synchronous>, transform_indices = @transform_5, window_bounds = array<i64: 1, 32>}, {pipeline_mode = #tpu.pipeline_mode<synchronous>, transform_indices = @transform_6, window_bounds = array<i64: 1, 32>}, {transform_indices = @transform_7, window_bounds = array<i64: 16, 32>}]} {
    %c0 = arith.constant 0 : index
    %c0_0 = arith.constant 0 : index
    %0 = vector.load %arg1[%c0, %c0_0] : memref<16x32xf32, #tpu.memory_space<vmem>>, vector<16x32xf32>
    %1 = arith.truncf %0 : vector<16x32xf32> to vector<16x32xbf16>
    %c0_1 = arith.constant 0 : index
    %c0_2 = arith.constant 0 : index
    %2 = vector.load %arg2[%c0_1, %c0_2] : memref<32x64xbf16, #tpu.memory_space<vmem>>, vector<32x64xbf16>
    %cst = arith.constant dense<0.000000e+00> : vector<16x64xf32>
    %3 = tpu.matmul %1, %2, %cst {dimension_numbers = #tpu.dot_dimension_numbers<[1], [0], [0], [1], [0, 0, 1, 1], [], []>} : vector<16x32xbf16>, vector<32x64xbf16>, vector<16x64xf32> -> vector<16x64xf32>
    %c0_3 = arith.constant 0 : index
    %c0_4 = arith.constant 0 : index
    %4 = vector.load %arg3[%c0_3, %c0_4] : memref<1x64xf32, #tpu.memory_space<vmem>>, vector<1x64xf32>
    %5 = vector.broadcast %4 : vector<1x64xf32> to vector<16x64xf32>
    %6 = arith.addf %3, %5 : vector<16x64xf32>
    %cst_5 = arith.constant 5.000000e-01 : f32
    %7 = vector.broadcast %cst_5 : f32 to vector<16x64xf32>
    %8 = arith.mulf %7, %6 : vector<16x64xf32>
    %cst_6 = arith.constant 4.471500e-02 : f32
    %9 = vector.broadcast %cst_6 : f32 to vector<16x64xf32>
    %10 = arith.mulf %9, %6 : vector<16x64xf32>
    %11 = arith.mulf %10, %6 : vector<16x64xf32>
    %12 = arith.mulf %11, %6 : vector<16x64xf32>
    %13 = arith.addf %6, %12 : vector<16x64xf32>
    %cst_7 = arith.constant 0.797884583 : f32
    %14 = vector.broadcast %cst_7 : f32 to vector<16x64xf32>
    %15 = arith.mulf %14, %13 : vector<16x64xf32>
    %16 = math.tanh %15 : vector<16x64xf32>
    %cst_8 = arith.constant 1.000000e+00 : f32
    %17 = vector.broadcast %cst_8 : f32 to vector<16x64xf32>
    %18 = arith.addf %17, %16 : vector<16x64xf32>
    %19 = arith.mulf %8, %18 : vector<16x64xf32>
    %20 = arith.truncf %19 : vector<16x64xf32> to vector<16x64xbf16>
    %c0_9 = arith.constant 0 : index
    %c0_10 = arith.constant 0 : index
    %21 = vector.load %arg4[%c0_9, %c0_10] : memref<64x32xbf16, #tpu.memory_space<vmem>>, vector<64x32xbf16>
    %cst_11 = arith.constant dense<0.000000e+00> : vector<16x32xf32>
    %22 = tpu.matmul %20, %21, %cst_11 {dimension_numbers = #tpu.dot_dimension_numbers<[1], [0], [0], [1], [0, 0, 1, 1], [], []>} : vector<16x64xbf16>, vector<64x32xbf16>, vector<16x32xf32> -> vector<16x32xf32>
    %c0_12 = arith.constant 0 : index
    %c0_13 = arith.constant 0 : index
    %23 = vector.load %arg5[%c0_12, %c0_13] : memref<1x32xf32, #tpu.memory_space<vmem>>, vector<1x32xf32>
    %24 = vector.broadcast %23 : vector<1x32xf32> to vector<16x32xf32>
    %25 = arith.addf %22, %24 : vector<16x32xf32>
    %26 = arith.addf %25, %0 : vector<16x32xf32>
    %c0_14 = arith.constant 0 : index
    %c0_15 = arith.constant 0 : index
    %27 = vector.load %arg6[%c0_14, %c0_15] : memref<1x32xf32, #tpu.memory_space<vmem>>, vector<1x32xf32>
    %c0_16 = arith.constant 0 : index
    %c0_17 = arith.constant 0 : index
    %28 = vector.load %arg7[%c0_16, %c0_17] : memref<1x32xf32, #tpu.memory_space<vmem>>, vector<1x32xf32>
    %cst_18 = arith.constant dense<0.000000e+00> : vector<16xf32>
    %29 = vector.multi_reduction <add>, %26, %cst_18 [1] : vector<16x32xf32> to vector<16xf32>
    %30 = vector.shape_cast %29 : vector<16xf32> to vector<16x1xf32>
    %cst_19 = arith.constant 3.200000e+01 : f32
    %31 = vector.broadcast %cst_19 : f32 to vector<16x1xf32>
    %32 = arith.divf %30, %31 : vector<16x1xf32>
    %33 = vector.broadcast %32 : vector<16x1xf32> to vector<16x32xf32>
    %34 = arith.subf %26, %33 : vector<16x32xf32>
    %35 = arith.mulf %34, %34 : vector<16x32xf32>
    %cst_20 = arith.constant dense<0.000000e+00> : vector<16xf32>
    %36 = vector.multi_reduction <add>, %35, %cst_20 [1] : vector<16x32xf32> to vector<16xf32>
    %37 = vector.shape_cast %36 : vector<16xf32> to vector<16x1xf32>
    %cst_21 = arith.constant 3.200000e+01 : f32
    %38 = vector.broadcast %cst_21 : f32 to vector<16x1xf32>
    %39 = arith.divf %37, %38 : vector<16x1xf32>
    %cst_22 = arith.constant 9.99999996E-13 : f32
    %40 = vector.broadcast %cst_22 : f32 to vector<16x1xf32>
    %41 = arith.addf %39, %40 : vector<16x1xf32>
    %42 = math.rsqrt %41 : vector<16x1xf32>
    %43 = vector.broadcast %42 : vector<16x1xf32> to vector<16x32xf32>
    %44 = arith.mulf %34, %43 : vector<16x32xf32>
    %45 = vector.broadcast %27 : vector<1x32xf32> to vector<16x32xf32>
    %46 = arith.mulf %44, %45 : vector<16x32xf32>
    %47 = vector.broadcast %28 : vector<1x32xf32> to vector<16x32xf32>
    %48 = arith.addf %46, %47 : vector<16x32xf32>
    %c0_23 = arith.constant 0 : index
    %c0_24 = arith.constant 0 : index
    %49 = vector.load %arg8[%c0_23, %c0_24] : memref<16x32xf32, #tpu.memory_space<vmem>>, vector<16x32xf32>
    tpu.vector_store %arg8[%c0_23, %c0_24], %48 {strides = array<i32>} : memref<16x32xf32, #tpu.memory_space<vmem>>, vector<16x32xf32>,
    return
  }
  func.func @transform_0(%arg0: i32) -> (i32, i32) {
    %c0_i32 = arith.constant 0 : i32
    %c0_i32_0 = arith.constant 0 : i32
    return %arg0, %c0_i32 : i32, i32
  }
  func.func @transform_1(%arg0: i32) -> (i32, i32) {
    %c0_i32 = arith.constant 0 : i32
    %c0_i32_0 = arith.constant 0 : i32
    %c0_i32_1 = arith.constant 0 : i32
    return %c0_i32, %c0_i32_0 : i32, i32
  }
  func.func @transform_2(%arg0: i32) -> (i32, i32) {
    %c0_i32 = arith.constant 0 : i32
    %c0_i32_0 = arith.constant 0 : i32
    %c0_i32_1 = arith.constant 0 : i32
    return %c0_i32, %c0_i32_0 : i32, i32
  }
  func.func @transform_3(%arg0: i32) -> (i32, i32) {
    %c0_i32 = arith.constant 0 : i32
    %c0_i32_0 = arith.constant 0 : i32
    %c0_i32_1 = arith.constant 0 : i32
    return %c0_i32, %c0_i32_0 : i32, i32
  }
  func.func @transform_4(%arg0: i32) -> (i32, i32) {
    %c0_i32 = arith.constant 0 : i32
    %c0_i32_0 = arith.constant 0 : i32
    %c0_i32_1 = arith.constant 0 : i32
    return %c0_i32, %c0_i32_0 : i32, i32
  }
  func.func @transform_5(%arg0: i32) -> (i32, i32) {
    %c0_i32 = arith.constant 0 : i32
    %c0_i32_0 = arith.constant 0 : i32
    %c0_i32_1 = arith.constant 0 : i32
    return %c0_i32, %c0_i32_0 : i32, i32
  }
  func.func @transform_6(%arg0: i32) -> (i32, i32) {
    %c0_i32 = arith.constant 0 : i32
    %c0_i32_0 = arith.constant 0 : i32
    %c0_i32_1 = arith.constant 0 : i32
    return %c0_i32, %c0_i32_0 : i32, i32
  }
  func.func @transform_7(%arg0: i32) -> (i32, i32) {
    %c0_i32 = arith.constant 0 : i32
    %c0_i32_0 = arith.constant 0 : i32
    return %arg0, %c0_i32 : i32, i32
  }
}

module attributes {stable_mosaic.version = 11 : i64} {
  func.func @_head_kernel(%arg0: memref<2x32xf32, #tpu.memory_space<vmem>>, %arg1: memref<32x32xbf16, #tpu.memory_space<vmem>>, %arg2: memref<1x32xf32, #tpu.memory_space<vmem>>, %arg3: memref<32x16xbf16, #tpu.memory_space<vmem>>, %arg4: memref<1x16xf32, #tpu.memory_space<vmem>>, %arg5: memref<16x5xbf16, #tpu.memory_space<vmem>>, %arg6: memref<1x5xf32, #tpu.memory_space<vmem>>, %arg7: memref<2x5xf32, #tpu.memory_space<vmem>>, %arg8: memref<2x5xf32, #tpu.memory_space<vmem>>, %arg9: memref<1x1xf32, #tpu.memory_space<vmem>>) attributes {dimension_semantics = [], scalar_prefetch = 0 : i64, scratch_operands = 0 : i64, tpu.core_type = #tpu.core_type<tc>} {
    %c0 = arith.constant 0 : index
    %c0_0 = arith.constant 0 : index
    %0 = vector.load %arg0[%c0, %c0_0] : memref<2x32xf32, #tpu.memory_space<vmem>>, vector<2x32xf32>
    %1 = arith.truncf %0 : vector<2x32xf32> to vector<2x32xbf16>
    %c0_1 = arith.constant 0 : index
    %c0_2 = arith.constant 0 : index
    %2 = vector.load %arg1[%c0_1, %c0_2] : memref<32x32xbf16, #tpu.memory_space<vmem>>, vector<32x32xbf16>
    %cst = arith.constant dense<0.000000e+00> : vector<2x32xf32>
    %3 = tpu.matmul %1, %2, %cst {dimension_numbers = #tpu.dot_dimension_numbers<[1], [0], [0], [1], [0, 0, 1, 1], [], []>} : vector<2x32xbf16>, vector<32x32xbf16>, vector<2x32xf32> -> vector<2x32xf32>
    %c0_3 = arith.constant 0 : index
    %c0_4 = arith.constant 0 : index
    %4 = vector.load %arg2[%c0_3, %c0_4] : memref<1x32xf32, #tpu.memory_space<vmem>>, vector<1x32xf32>
    %5 = vector.broadcast %4 : vector<1x32xf32> to vector<2x32xf32>
    %6 = arith.addf %3, %5 : vector<2x32xf32>
    %7 = math.tanh %6 : vector<2x32xf32>
    %8 = arith.truncf %7 : vector<2x32xf32> to vector<2x32xbf16>
    %c0_5 = arith.constant 0 : index
    %c0_6 = arith.constant 0 : index
    %9 = vector.load %arg3[%c0_5, %c0_6] : memref<32x16xbf16, #tpu.memory_space<vmem>>, vector<32x16xbf16>
    %cst_7 = arith.constant dense<0.000000e+00> : vector<2x16xf32>
    %10 = tpu.matmul %8, %9, %cst_7 {dimension_numbers = #tpu.dot_dimension_numbers<[1], [0], [0], [1], [0, 0, 1, 1], [], []>} : vector<2x32xbf16>, vector<32x16xbf16>, vector<2x16xf32> -> vector<2x16xf32>
    %c0_8 = arith.constant 0 : index
    %c0_9 = arith.constant 0 : index
    %11 = vector.load %arg4[%c0_8, %c0_9] : memref<1x16xf32, #tpu.memory_space<vmem>>, vector<1x16xf32>
    %12 = vector.broadcast %11 : vector<1x16xf32> to vector<2x16xf32>
    %13 = arith.addf %10, %12 : vector<2x16xf32>
    %14 = arith.truncf %13 : vector<2x16xf32> to vector<2x16xbf16>
    %c0_10 = arith.constant 0 : index
    %c0_11 = arith.constant 0 : index
    %15 = vector.load %arg5[%c0_10, %c0_11] : memref<16x5xbf16, #tpu.memory_space<vmem>>, vector<16x5xbf16>
    %cst_12 = arith.constant dense<0.000000e+00> : vector<2x5xf32>
    %16 = tpu.matmul %14, %15, %cst_12 {dimension_numbers = #tpu.dot_dimension_numbers<[1], [0], [0], [1], [0, 0, 1, 1], [], []>} : vector<2x16xbf16>, vector<16x5xbf16>, vector<2x5xf32> -> vector<2x5xf32>
    %c0_13 = arith.constant 0 : index
    %c0_14 = arith.constant 0 : index
    %17 = vector.load %arg6[%c0_13, %c0_14] : memref<1x5xf32, #tpu.memory_space<vmem>>, vector<1x5xf32>
    %18 = vector.broadcast %17 : vector<1x5xf32> to vector<2x5xf32>
    %19 = arith.addf %16, %18 : vector<2x5xf32>
    %c0_15 = arith.constant 0 : index
    %c0_16 = arith.constant 0 : index
    %20 = vector.load %arg8[%c0_15, %c0_16] : memref<2x5xf32, #tpu.memory_space<vmem>>, vector<2x5xf32>
    tpu.vector_store %arg8[%c0_15, %c0_16], %19 {strides = array<i32>} : memref<2x5xf32, #tpu.memory_space<vmem>>, vector<2x5xf32>,
    %c0_17 = arith.constant 0 : index
    %c0_18 = arith.constant 0 : index
    %21 = vector.load %arg7[%c0_17, %c0_18] : memref<2x5xf32, #tpu.memory_space<vmem>>, vector<2x5xf32>
    %cst_19 = arith.constant 0.000000e+00 : f32
    %22 = vector.broadcast %cst_19 : f32 to vector<2x5xf32>
    %23 = arith.maximumf %19, %22 : vector<2x5xf32>
    %24 = arith.mulf %19, %21 : vector<2x5xf32>
    %25 = arith.subf %23, %24 : vector<2x5xf32>
    %26 = math.absf %19 : vector<2x5xf32>
    %cst_20 = arith.constant 0.000000e+00 : f32
    %27 = vector.broadcast %cst_20 : f32 to vector<2x5xf32>
    %28 = arith.subf %27, %26 : vector<2x5xf32>
    %29 = math.exp %28 : vector<2x5xf32>
    %30 = math.log1p %29 : vector<2x5xf32>
    %31 = arith.addf %25, %30 : vector<2x5xf32>
    %32 = vector.shape_cast %31 : vector<2x5xf32> to vector<1x2x5xf32>
    %cst_21 = arith.constant dense<0.000000e+00> : vector<1xf32>
    %33 = vector.multi_reduction <add>, %32, %cst_21 [1, 2] : vector<1x2x5xf32> to vector<1xf32>
    %34 = vector.shape_cast %33 : vector<1xf32> to vector<1x1x1xf32>
    %35 = vector.extract %34[0, 0, 0] : f32 from vector<1x1x1xf32>
    %36 = vector.broadcast %35 : f32 to vector<1x1xf32>
    %cst_22 = arith.constant 1.000000e+01 : f32
    %37 = vector.broadcast %cst_22 : f32 to vector<1x1xf32>
    %38 = arith.divf %36, %37 : vector<1x1xf32>
    %c0_23 = arith.constant 0 : index
    %c0_24 = arith.constant 0 : index
    %39 = vector.load %arg9[%c0_23, %c0_24] : memref<1x1xf32, #tpu.memory_space<vmem>>, vector<1x1xf32>
    tpu.vector_store %arg9[%c0_23, %c0_24], %38 {strides = array<i32>} : memref<1x1xf32, #tpu.memory_space<vmem>>, vector<1x1xf32>,
    return
  }
}

</mosaic_0001>

<bundles_post_ra>
// kernel: bert_seq_cls_forward.6
= control target key start
LH: loop header
LB: loop body
LE: loop exit
PB: predicated region body
PF: predicated region fallthrough
CT: control target
= control target key end

     0   :  { %vm18_vm0 = vcmask 261120   ;;  %s118_s0 = inlined_call_operand.vmem [shape: f32[16,32], index: 0, kind: input, shape index: {}]   ;;  %s119_s1 = inlined_call_operand.vmem [shape: f32[1,32], index: 1, kind: input, shape index: {}]   ;;  %s120_s2 = inlined_call_operand.vmem [shape: f32[1,32], index: 2, kind: input, shape index: {}]   ;;  %s121_s3 = inlined_call_operand.vmem [shape: f32[16,32], index: 3, kind: output, shape index: {}]  }
   0x1   :  { %v14_v0 = vld [vmem:[%s118_s0] sm:$0xff]  ;;  %v15_v1 = vld [vmem:[%s118_s0 + $0x8] sm:$0xff] }
   0x2   :  { %v19_v2 = vsel %vm18_vm0, %v14_v0, 0.0  ;;  %v22_v3 = vsel %vm18_vm0, %v15_v1, 0.0  ;;  %v68_v21 = vld [vmem:[%s119_s1] ss:$0 sm:$0xff] }
   0x3   :  { %20 = vadd.xlane.f32.xlu0 %v19_v2  ;;  %v69_v23 = vld [vmem:[%s120_s2] ss:$0 sm:$0xff] }
   0x7   :  { %23 = vadd.xlane.f32.xlu0 %v22_v3 }
  0x90   :  { %v21_v4 = vpop.xlane.xlu0 %20 }
  0x91   :  { %v26_v5 = vmul.f32 0.03125, %v21_v4 }
  0x93   :  { %v28_v6 = vsub.f32 %v14_v0, %v26_v5 }
  0x94   :  { %v24_v7 = vpop.xlane.xlu0 %23 }
  0x95   :  { %v27_v8 = vmul.f32 0.03125, %v24_v7  ;;  %v30_v9 = vmul.f32 %v28_v6, %v28_v6 }
  0x97   :  { %v29_v10 = vsub.f32 %v15_v1, %v27_v8  ;;  %v32_v11 = vsel %vm18_vm0, %v30_v9, 0.0 }
  0x98   :  { %33 = vadd.xlane.f32.xlu1 %v32_v11 }
  0x99   :  { %v31_v12 = vmul.f32 %v29_v10, %v29_v10 }
  0x9b   :  { %v35_v13 = vsel %vm18_vm0, %v31_v12, 0.0 }
  0x9c   :  { %36 = vadd.xlane.f32.xlu1 %v35_v13 }
 0x125   :  { %v34_v14 = vpop.xlane.xlu1 %33 }
 0x126   :  { %v38_v15 = vmul.f32 0.03125, %v34_v14 }
 0x128   :  { %v40_v16 = vadd.f32 1e-12, %v38_v15 }
 0x129   :  { %v37_v17 = vpop.xlane.xlu1 %36 }
 0x12a   :  { %70 = vrsqrt.f32 %v40_v16  ;;  %v39_v18 = vmul.f32 0.03125, %v37_v17 }
 0x12c   :  { %v41_v19 = vadd.f32 1e-12, %v39_v18 }
 0x12e   :  { %72 = vrsqrt.f32 %v41_v19 }
 0x134   :  { %v71_v20 = vpop.eup %70 }
 0x135   :  { %v44_v22 = vmul.f32 %v71_v20, %v28_v6 }
 0x137   :  { %v52_v24 = vmul.f32 %v68_v21, %v44_v22 }
 0x138   :  { %v73_v25 = vpop.eup %72 }
 0x139   :  { %v60_v26 = vadd.f32 %v69_v23, %v52_v24  ;;  %v45_v27 = vmul.f32 %v73_v25, %v29_v10 }
 0x13b   :  { %62 = vst.msk [vmem:[%s121_s3] sm:$0xff] %vm18_vm0, %v60_v26  ;;  %v53_v28 = vmul.f32 %v68_v21, %v45_v27 }
 0x13d   :  { %v61_v29 = vadd.f32 %v69_v23, %v53_v28 }
 0x13f   :  { %63 = vst.msk [vmem:[%s121_s3 + $0x8] sm:$0xff] %vm18_vm0, %v61_v29 }

// kernel: bert_seq_cls_forward.8
= control target key start
LH: loop header
LB: loop body
LE: loop exit
PB: predicated region body
PF: predicated region fallthrough
CT: control target
= control target key end

     0   :  { %v310_v0 = vmov 0.0   ;;  %vm311_vm0 = vmmov 0   ;;  %vm53_vm1 = vcmask 261120   ;;  %vm156_vm2 = vcmask 523264   ;;  %s401_s1 = inlined_call_operand.vmem [shape: bf16[32,64], index: 1, kind: input, shape index: {}]   ;;  %s402_s0 = inlined_call_operand.vmem [shape: f32[16,32], index: 0, kind: input, shape index: {}]   ;;  %s403_s3 = inlined_call_operand.vmem [shape: bf16[64,32], index: 3, kind: input, shape index: {}]   ;;  %s404_s2 = inlined_call_operand.vmem [shape: f32[1,64], index: 2, kind: input, shape index: {}]   ;;  %s405_s4 = inlined_call_operand.vmem [shape: f32[1,32], index: 4, kind: input, shape index: {}]   ;;  %s406_s5 = inlined_call_operand.vmem [shape: f32[1,32], index: 5, kind: input, shape index: {}]   ;;  %s407_s6 = inlined_call_operand.vmem [shape: f32[1,32], index: 6, kind: input, shape index: {}]   ;;  %s408_s7 = inlined_call_operand.vmem [shape: f32[16,32], index: 7, kind: output, shape index: {}]  }
   0x1   :  { %274 = vmatprep.subr.bf16.mxu0 %v310_v0  ;;  %v296_v1 = vld [vmem:[%s401_s1] sm:$0xff]   ;;  %278 = vmatprep.mubr.msk.bf16.mxu0 %vm311_vm0, %v310_v0  ;;  %v297_v2 = vld [vmem:[%s401_s1 + $0x8] sm:$0xff]   ;;  %v300_v8 = vld [vmem:[%s403_s3 + $0x10] sm:$0xff]  }
   0x2   :  { %282 = vmatprep.subr.bf16.mxu1 %v310_v0  ;;  %290 = vmatprep.mubr.msk.bf16.mxu1 %vm311_vm0, %v310_v0  ;;  %v27_v3 = vld [vmem:[%s402_s0] sm:$0xff]  ;;  %v28_v4 = vld [vmem:[%s402_s0 + $0x8] sm:$0xff]  ;;  %v301_v9 = vld [vmem:[%s403_s3 + $0x18] sm:$0xff]  }
   0x3   :  { %275 = vmatpush3.bf16.msra.mxu0 %v296_v1  ;;  %v29_v5 = vpack.c.bf16 %v28_v4, %v27_v3  ;;  %v298_v6 = vld [vmem:[%s403_s3] sm:$0xff]   ;;  %v299_v7 = vld [vmem:[%s403_s3 + $0x8] sm:$0xff]  }
   0x4   :  { %276 = vmatprep.subr.bf16.mxu0 %v310_v0  ;;  %283 = vmatpush3.bf16.msra.mxu1 %v298_v6  ;;  %v254_v10 = vld [vmem:[%s404_s2] ss:$0 sm:$0xff] }
   0x5   :  { %284 = vmatprep.subr.bf16.mxu1 %v310_v0  ;;  %v258_v36 = vld [vmem:[%s405_s4] ss:$0 sm:$0xff] }
   0x7   :  { %277 = vmatpush3.bf16.msra.mxu0 %v297_v2  ;;  %v265_v2 = vld [vmem:[%s407_s6] ss:$0 sm:$0xff] }
   0x8   :  { %285 = vmatpush3.bf16.msra.mxu1 %v299_v7 }
   0x9   :  { %286 = vmatprep.subr.bf16.mxu1 %v310_v0 }
   0xa   :  { %279 = vmatmul.mubr.msk.bf16.vlgmr.msra.gmra.mrb[0].mxu0 %vm53_vm1, %v29_v5 }
   0xc   :  { %287 = vmatpush3.bf16.msra.mxu1 %v300_v8 }
   0xd   :  { %288 = vmatprep.subr.bf16.mxu1 %v310_v0  ;;  %v264_v0 = vld [vmem:[%s406_s5] ss:$0 sm:$0xff] }
  0x10   :  { %289 = vmatpush3.bf16.msra.mxu1 %v301_v9 }
  0xdd   :  { %v91_v11 = vpop.f32.mrb[0].mxu0 }
  0xde   :  { %v92_v12 = vadd.f32 %v254_v10, %v91_v11  ;;  %v280_v13 = vpop.f32.mrb[1].mxu0 }
  0xdf   :  { %v94_v14 = vpop.f32.mrb[2].mxu0 }
  0xe0   :  { %v100_v15 = vmul.f32 0.044715, %v92_v12  ;;  %v95_v16 = vadd.f32 %v254_v10, %v94_v14  ;;  %v281_v17 = vpop.f32.mrb[3].mxu0  ;;  %v98_v30 = vmul.f32 0.5, %v92_v12 }
  0xe2   :  { %v102_v18 = vmul.f32 %v100_v15, %v92_v12  ;;  %v101_v19 = vmul.f32 0.044715, %v95_v16  ;;  %v99_v31 = vmul.f32 0.5, %v95_v16 }
  0xe4   :  { %v104_v20 = vmul.f32 %v102_v18, %v92_v12  ;;  %v103_v21 = vmul.f32 %v101_v19, %v95_v16 }
  0xe6   :  { %v106_v22 = vadd.f32 %v104_v20, %v92_v12  ;;  %v105_v23 = vmul.f32 %v103_v21, %v95_v16 }
  0xe8   :  { %v108_v24 = vmul.f32 0.7978846, %v106_v22  ;;  %v107_v25 = vadd.f32 %v105_v23, %v95_v16 }
  0xea   :  { %302 = vtanh.f32 %v108_v24  ;;  %v109_v26 = vmul.f32 0.7978846, %v107_v25 }
  0xec   :  { %304 = vtanh.f32 %v109_v26 }
  0xf4   :  { %v303_v27 = vpop.eup %302 }
  0xf5   :  { %v112_v28 = vadd.f32 1.0, %v303_v27 }
  0xf6   :  { %v305_v29 = vpop.eup %304 }
  0xf7   :  { %v113_v32 = vadd.f32 1.0, %v305_v29  ;;  %v114_v33 = vmul.f32 %v112_v28, %v98_v30 }
  0xf9   :  { %v115_v34 = vmul.f32 %v113_v32, %v99_v31 }
  0xfb   :  { %v116_v35 = vpack.c.bf16 %v115_v34, %v114_v33 }
  0xfd   :  { %291 = vmatmul.mubr.msk.bf16.vlgmr.msra.gmra.mrb[0].mxu1 %vm156_vm2, %v116_v35 }
 0x1d0   :  { %v194_v37 = vpop.f32.mrb[0].mxu1 }
 0x1d1   :  { %v195_v38 = vadd.f32 %v258_v36, %v194_v37  ;;  %v292_v39 = vpop.f32.mrb[1].mxu1 }
 0x1d2   :  { %v197_v40 = vpop.f32.mrb[2].mxu1 }
 0x1d3   :  { %v198_v41 = vadd.f32 %v258_v36, %v197_v40  ;;  %v293_v42 = vpop.f32.mrb[3].mxu1  ;;  %v201_v43 = vadd.f32 %v195_v38, %v27_v3 }
 0x1d5   :  { %v205_v44 = vsel %vm53_vm1, %v201_v43, 0.0  ;;  %v202_v45 = vadd.f32 %v198_v41, %v28_v4 }
 0x1d6   :  { %206 = vadd.xlane.f32.xlu0 %v205_v44 }
 0x1d7   :  { %v208_v46 = vsel %vm53_vm1, %v202_v45, 0.0 }
 0x1da   :  { %209 = vadd.xlane.f32.xlu0 %v208_v46 }
 0x263   :  { %v207_v47 = vpop.xlane.xlu0 %206 }
 0x264   :  { %v212_v48 = vmul.f32 0.03125, %v207_v47 }
 0x266   :  { %v214_v49 = vsub.f32 %v201_v43, %v212_v48 }
 0x267   :  { %v210_v50 = vpop.xlane.xlu0 %209 }
 0x268   :  { %v213_v51 = vmul.f32 0.03125, %v210_v50  ;;  %v216_v52 = vmul.f32 %v214_v49, %v214_v49 }
 0x26a   :  { %v215_v53 = vsub.f32 %v202_v45, %v213_v51  ;;  %v218_v54 = vsel %vm53_vm1, %v216_v52, 0.0 }
 0x26b   :  { %219 = vadd.xlane.f32.xlu1 %v218_v54 }
 0x26c   :  { %v217_v55 = vmul.f32 %v215_v53, %v215_v53 }
 0x26e   :  { %v221_v56 = vsel %vm53_vm1, %v217_v55, 0.0 }
 0x26f   :  { %222 = vadd.xlane.f32.xlu1 %v221_v56 }
 0x2f8   :  { %v220_v57 = vpop.xlane.xlu1 %219 }
 0x2f9   :  { %v224_v58 = vmul.f32 0.03125, %v220_v57 }
 0x2fb   :  { %v226_v59 = vadd.f32 1e-12, %v224_v58 }
 0x2fc   :  { %v223_v60 = vpop.xlane.xlu1 %222 }
 0x2fd   :  { %306 = vrsqrt.f32 %v226_v59  ;;  %v225_v61 = vmul.f32 0.03125, %v223_v60 }
 0x2ff   :  { %v227_v62 = vadd.f32 1e-12, %v225_v61 }
 0x301   :  { %308 = vrsqrt.f32 %v227_v62 }
 0x307   :  { %v307_v63 = vpop.eup %306 }
 0x308   :  { %v230_v1 = vmul.f32 %v307_v63, %v214_v49 }
 0x30a   :  { %v238_v3 = vmul.f32 %v264_v0, %v230_v1 }
 0x30b   :  { %v309_v4 = vpop.eup %308 }
 0x30c   :  { %v246_v5 = vadd.f32 %v265_v2, %v238_v3  ;;  %v231_v6 = vmul.f32 %v309_v4, %v215_v53 }
 0x30e   :  { %248 = vst.msk [vmem:[%s408_s7] sm:$0xff] %vm53_vm1, %v246_v5  ;;  %v239_v7 = vmul.f32 %v264_v0, %v231_v6 }
 0x310   :  { %v247_v8 = vadd.f32 %v265_v2, %v239_v7 }
 0x312   :  { %249 = vst.msk [vmem:[%s408_s7 + $0x8] sm:$0xff] %vm53_vm1, %v247_v8 }

// kernel: bert_seq_cls_forward.11
= control target key start
LH: loop header
LB: loop body
LE: loop exit
PB: predicated region body
PF: predicated region fallthrough
CT: control target
= control target key end

     0   :  { %15 = vsyncpa [#allocation3], 0  ;;  %v400_v1 = vmov 0.0   ;;  %vm401_vm0 = vmmov 0   ;;  %s512_s0 = inlined_call_operand.vmem [shape: f32[2,32], index: 0, kind: input, shape index: {}]   ;;  %s513_s1 = inlined_call_operand.vmem [shape: bf16[32,32], index: 1, kind: input, shape index: {}]   ;;  %s514_s2 = inlined_call_operand.vmem [shape: f32[1,32], index: 2, kind: input, shape index: {}]   ;;  %s515_s3 = inlined_call_operand.vmem [shape: bf16[32,16], index: 3, kind: input, shape index: {}]   ;;  %s516_s4 = inlined_call_operand.vmem [shape: f32[1,16], index: 4, kind: input, shape index: {}]   ;;  %s517_s5 = inlined_call_operand.vmem [shape: bf16[16,5], index: 5, kind: input, shape index: {}]   ;;  %s518_s6 = inlined_call_operand.vmem [shape: f32[1,5], index: 6, kind: input, shape index: {}]   ;;  %s519_s7 = inlined_call_operand.vmem [shape: f32[2,5], index: 7, kind: input, shape index: {}]   ;;  %s520_s8 = inlined_call_operand.hbm [shape: f32[2,5], index: 8, kind: output, shape index: {0}]   ;;  %s521_s9 = inlined_call_operand.hbm [shape: f32[1,1], index: 9, kind: output, shape index: {1}]  }
   0x1   :  { %v341_v0 = vld [vmem:[%s513_s1] sm:$0xff]   ;;  %313 = vmatprep.subr.bf16.mxu0 %v400_v1  ;;  %321 = vmatprep.subr.bf16.mxu1 %v400_v1  ;;  %v342_v2 = vld [vmem:[%s513_s1 + $0x8] sm:$0xff]  }
   0x2   :  { %314 = vmatpush3.bf16.msra.mxu0 %v341_v0  ;;  %317 = vmatprep.mubr.msk.bf16.mxu0 %vm401_vm0, %v400_v1  ;;  %v34_v3 = vld [vmem:[%s512_s0] sm:$0x3] }
   0x3   :  { %315 = vmatprep.subr.bf16.mxu0 %v400_v1  ;;  %325 = vmatprep.mubr.msk.bf16.mxu1 %vm401_vm0, %v400_v1  ;;  %v35_v4 = vpack.c.bf16 %v34_v3, %v34_v3 }
   0x4   :  { %16 = vsyncpa [#allocation5], 0  ;;  %vm59_vm1 = vcmask 261120   ;;  %v343_v5 = vld [vmem:[%s515_s3] sm:$0xff]   ;;  %v344_v6 = vld [vmem:[%s515_s3 + $0x8] sm:$0xff]   ;;  %vm187_vm2 = vcmask 130048  }
   0x5   :  { %322 = vmatpush3.bf16.msra.mxu1 %v343_v5  ;;  %v345_v7 = vld [vmem:[%s517_s5] sm:$0xff]   ;;  %vm231_vm3 = vcmask 33792  }
   0x6   :  { %316 = vmatpush3.bf16.msra.mxu0 %v342_v2  ;;  %323 = vmatprep.subr.bf16.mxu1 %v400_v1  ;;  %v294_v8 = vld [vmem:[%s514_s2] ss:$0 sm:$0xff] }
   0x7   :  { %329 = vmatprep.subr.bf16.mxu0 %v400_v1  ;;  %v298_v16 = vld [vmem:[%s516_s4] ss:$0 sm:$0xff] }
   0x8   :  { %v302_v23 = vld [vmem:[%s518_s6] ss:$0 sm:$0xff]  ;;  %s402_s6 = smov [#allocation2]  }
   0x9   :  { %318 = vmatmul.mubr.msk.bf16.vlgmr.msra.gmra.mrb[0].mxu0 %vm59_vm1, %v35_v4  ;;  %324 = vmatpush3.bf16.msra.mxu1 %v344_v6  ;;  %v233_v35 = vld [vmem:[%s519_s7] sm:$0x3]  ;;  %s272_s23 = sshll.u32 %s402_s6, 4  ;;  %s273_s23 = int_to_ptr.vmem [resolvable:$true] %s272_s23 }
   0xa   :  { %331 = vmatprep.mubr.msk.bf16.mxu0 %vm401_vm0, %v400_v1  ;;  %330 = vmatpush3.bf16.msra.mxu0 %v345_v7  ;;  %s352_s24 = scalar_lea.vmem %s273_s23, 32  ;;  %p357_p1 = scmp.lt.s32.totalorder %s273_s23, %s273_s23 }
   0xb   :  { %p353_p0 = scmp.ne.s32.totalorder %s273_s23, %s352_s24  ;;  %p358_p2 = scmp.lt.s32.totalorder %s352_s24, %s352_s24 }
   0xd   :  { %p359_p3 = por %p358_p2, %p357_p1 }
   0xf   :  { %p360_p4 = pnand %p359_p3, %p353_p0 }
  0xdc   :  { %v97_v9 = vpop.f32.mrb[0].mxu0 }
  0xdd   :  { %v98_v10 = vadd.f32 %v294_v8, %v97_v9  ;;  %v319_v11 = vpop.f32.mrb[1].mxu0 }
  0xde   :  { %v100_v12 = vpop.f32.mrb[2].mxu0 }
  0xdf   :  { %346 = vtanh.f32 %v98_v10  ;;  %v320_v13 = vpop.f32.mrb[3].mxu0 }
  0xe9   :  { %v347_v14 = vpop.eup %346 }
  0xea   :  { %v104_v15 = vpack.c.bf16 %v347_v14, %v347_v14 }
  0xec   :  { %326 = vmatmul.mubr.msk.bf16.vlgmr.msra.gmra.mrb[0].mxu1 %vm59_vm1, %v104_v15 }
 0x1bf   :  { %v165_v17 = vpop.f32.mrb[0].mxu1 }
 0x1c0   :  { %v166_v18 = vadd.f32 %v298_v16, %v165_v17  ;;  %v327_v19 = vpop.f32.mrb[1].mxu1 }
 0x1c1   :  { %v168_v20 = vpop.f32.mrb[2].mxu1 }
 0x1c2   :  { %v171_v21 = vpack.c.bf16 %v166_v18, %v166_v18  ;;  %v328_v22 = vpop.f32.mrb[3].mxu1 }
 0x1c4   :  { %332 = vmatmul.mubr.msk.bf16.vlgmr.msra.gmra.mrb[4].mxu0 %vm187_vm2, %v171_v21 }
 0x297   :  { %v225_v24 = vpop.f32.mrb[4].mxu0 }
 0x298   :  { %v226_v25 = vadd.f32 %v302_v23, %v225_v24  ;;  %v333_v26 = vpop.f32.mrb[5].mxu0 }
 0x299   :  { %v228_v27 = vpop.f32.mrb[6].mxu0 }
 0x29a   :  { %v237_v28 = vand.u32 2147483647, %v226_v25  ;;  %v334_v29 = vpop.f32.mrb[7].mxu0  ;;  %232 = vst.msk [vmem:[#allocation2] sm:$0x3] %vm231_vm3, %v226_v25  ;;  %v234_v37 = vmax.f32 %v226_v25, 0.0  ;;  %v235_v38 = vmul.f32 %v233_v35, %v226_v25 }
 0x29c   :  { %v238_v30 = vsub.f32 0.0, %v237_v28  ;;  %v236_v43 = vsub.f32 %v234_v37, %v235_v38 }
 0x29e   :  { %v239_v31 = vmul.f32 1.442695, %v238_v30 }
 0x2a0   :  { %348 = vpow2.f32 %v239_v31 }
 0x2aa   :  { %v349_v32 = vpop.eup %348 }
 0x2ab   :  { %v241_v33 = vadd.f32 1.0, %v349_v32  ;;  %v244_v34 = vmul.f32 -0.5, %v349_v32  ;;  %v247_v39 = vand.u32 2147483647, %v349_v32 }
 0x2ad   :  { %350 = vlog2.f32 %v241_v33  ;;  %v245_v36 = vadd.f32 1.0, %v244_v34  ;;  %vm248_vm4 = vcmp.lt.f32.partialorder %v247_v39, 0.0004427343 }
 0x2af   :  { %v246_v42 = vmul.f32 %v349_v32, %v245_v36 }
 0x2b7   :  { %v351_v40 = vpop.eup %350 }
 0x2b8   :  { %v243_v41 = vmul.f32 0.6931472, %v351_v40 }
 0x2ba   :  { %v249_v44 = vsel %vm248_vm4, %v246_v42, %v243_v41 }
 0x2bb   :  { %v250_v45 = vadd.f32 %v249_v44, %v236_v43 }
 0x2bd   :  { %v251_v46 = vsel %vm231_vm3, %v250_v45, 0.0 }
 0x2be   :  { %252 = vadd.xlane.f32.xlu0 %v251_v46 }
 0x2bf   :  { %363 = shalt.err (!%p360_p4)
}
 0x2c0   :  { %s364_s26 = scalar_lea.hbm %s520_s8, 32 }
 0x2c1   :  { %p365_p5 = scmp.ne.s32.totalorder %s520_s8, %s364_s26  ;;  %p368_p6 = scmp.lt.u32.totalorder %s364_s26, %s520_s8 }
 0x2c3   :  { %p370_p7 = pnand %p368_p6, %p365_p5 }
 0x2c5   :  { %373 = shalt.err (!%p370_p7)
}
 0x2c6   :  { %275 = dma.vmem_to_hbm [thread:$0]  %s273_s23, 32, %s520_s8, [#allocation3]   ;;  %vm264_vm5 = vcmask 0  }
 0x2c7   :  { %s403_s12 = smov [#allocation4]  }
 0x2c8   :  { %s282_s13 = sshll.u32 %s403_s12, 4  ;;  %s283_s13 = int_to_ptr.vmem [resolvable:$true] %s282_s13 }
 0x2c9   :  { %s374_s15 = scalar_lea.vmem %s283_s13, 16  ;;  %s378_s16 = scalar_lea.vmem %s283_s13, 32 }
 0x2ca   :  { %p375_p8 = scmp.ne.s32.totalorder %s283_s13, %s374_s15  ;;  %p379_p9 = scmp.lt.s32.totalorder %s283_s13, %s283_s13 }
 0x2cb   :  { %p380_p10 = scmp.lt.s32.totalorder %s378_s16, %s374_s15 }
 0x2cd   :  { %p381_p11 = por %p380_p10, %p379_p9 }
 0x2cf   :  { %p382_p12 = pnand %p381_p11, %p375_p8 }
 0x34b   :  { %v253_v47 = vpop.xlane.xlu0 %252 }
 0x34c   :  { %v254_v48 = vrot.slane %v253_v47, 4 }
 0x34e   :  { %v255_v49 = vadd.f32 %v254_v48, %v253_v47 }
 0x350   :  { %v256_v50 = vrot.slane %v255_v49, 2 }
 0x352   :  { %v257_v51 = vadd.f32 %v256_v50, %v255_v49 }
 0x354   :  { %v258_v52 = vrot.slane %v257_v51, 1 }
 0x356   :  { %v259_v53 = vadd.f32 %v258_v52, %v257_v51 }
 0x358   :  { %335 = vpush %v259_v53 }
 0x389   :  { %s336_s14 = spop %335 }
 0x38a   :  { %v261_v54 = vstv %s336_s14 }
 0x38b   :  { %v263_v55 = vmul.f32 0.1, %v261_v54 }
 0x38d   :  { %265 = vst.msk [vmem:[#allocation4] sm:$0x1] %vm264_vm5, %v263_v55 }
 0x38e   :  { %385 = shalt.err (!%p382_p12)
}
 0x38f   :  { %s386_s17 = scalar_lea.hbm %s521_s9, 16 }
 0x390   :  { %p387_p13 = scmp.ne.s32.totalorder %s521_s9, %s386_s17  ;;  %p390_p0 = scmp.lt.u32.totalorder %s386_s17, %s521_s9 }
 0x392   :  { %p392_p1 = pnand %p390_p0, %p387_p13 }
 0x394   :  { %395 = shalt.err (!%p392_p1)
}
 0x395   :  { %285 = dma.vmem_to_hbm [thread:$0]  %s283_s13, 16, %s521_s9, [#allocation5]  }
 0x396   :  { %396 = dma.done.wait [#allocation3], 32  }
 0x397   :  { %397 = vsyncadd [#allocation3], 4294967264 }
 0x398   :  { %398 = dma.done.wait [#allocation5], 16  }
 0x399   :  { %399 = vsyncadd [#allocation5], 4294967280 }
 0x39a   :  { %292 = vsyncpa [#allocation3], 1 }
 0x39b   :  { %293 = vsyncpa [#allocation5], 1 }

// kernel: bert_seq_cls_forward.7
= control target key start
LH: loop header
LB: loop body
LE: loop exit
PB: predicated region body
PF: predicated region fallthrough
CT: control target
= control target key end

     0   :  { %s1267_s17 = smov 0   ;;  %s1269_s18 = smov 0   ;;  %s1400_s0 = inlined_call_operand.vmem [shape: f32[2,8,32], index: 0, kind: input, shape index: {}, may-alias: {0,1}]   ;;  %s1401_s1 = inlined_call_operand.vmem [shape: f32[2,8,32], index: 1, kind: input, shape index: {}, may-alias: {0,1}]   ;;  %s1402_s2 = inlined_call_operand.vmem [shape: f32[2,1,8], index: 2, kind: input, shape index: {}]   ;;  %s1403_s3 = inlined_call_operand.vmem [shape: bf16[32,32], index: 3, kind: input, shape index: {}]   ;;  %s1404_s4 = inlined_call_operand.vmem [shape: f32[1,32], index: 4, kind: input, shape index: {}]   ;;  %s1405_s5 = inlined_call_operand.vmem [shape: bf16[32,64], index: 5, kind: input, shape index: {}]   ;;  %s1406_s6 = inlined_call_operand.vmem [shape: f32[1,64], index: 6, kind: input, shape index: {}]   ;;  %s1407_s7 = inlined_call_operand.vmem [shape: bf16[32,32], index: 7, kind: input, shape index: {}]   ;;  %s1408_s8 = inlined_call_operand.vmem [shape: f32[1,32], index: 8, kind: input, shape index: {}]   ;;  %s1409_s9 = inlined_call_operand.vmem [shape: f32[1,32], index: 9, kind: input, shape index: {}]   ;;  %s1410_s10 = inlined_call_operand.vmem [shape: f32[1,32], index: 10, kind: input, shape index: {}]   ;;  %s1411_s11 = inlined_call_operand.vmem [shape: f32[2,8,32], index: 11, kind: output, shape index: {}]  }
   0x1   :  { %s1271_s19 = smov 0  }
   0x2 LB: > { %s33_s20 = sadd.s32 1, %s1195_s18  ;;  %p1038_p0 = scmp.ge.s32.totalorder %s1199_s19, 1  ;;  %s1199_s19 = sphi %s1271_s19, %s21_s19   ;;  %s1195_s18 = sphi %s1269_s18, %s1413_s18   ;;  %s1191_s17 = sphi %s1267_s17, %s1412_s17  }
   0x3   : > { %p35_p1 = scmp.ge.s32.totalorder %s33_s20, 2  ;;  %p372_p2 = scmp.lt.s32.totalorder %s1199_s19, 3 }
   0x5   : > { %s1415_s20 = smov (%p35_p1, %s33_s20), 0  ;;  %p373_p3 = pnand %p1038_p0, %p372_p2 }
   0x6   : > { %v1159_v0 = vld [vmem:[%s1405_s5] sm:$0xff] (!%p373_p3)   ;;  %v1201_v1 = vmov (!%p373_p3), 0.0   ;;  %v1160_v2 = vld [vmem:[%s1405_s5 + $0x8] sm:$0xff] (!%p373_p3)   ;;  %vm1202_vm0 = vmmov (!%p373_p3), 0   ;;  %p423_p4 = scmp.lt.s32.totalorder (!%p373_p3), %s1191_s17, 1  ;;  %vm474_vm1 = vcmask (!%p373_p3), 261120   ;;  %v644_v29 = vlaneseq (!%p373_p3) }
   0x7   : > { %376 = sbr.rel (%p373_p3) target bundleno = 1767 (0x6e7), region = 64  ;;  %1081 = vmatprep.subr.bf16.mxu0 (!%p373_p3), %v1201_v1  ;;  %1089 = vmatprep.subr.bf16.mxu1 (!%p373_p3), %v1201_v1  ;;  %v1161_v3 = vld [vmem:[%s1403_s3] sm:$0xff] (!%p373_p3)   ;;  %v1162_v4 = vld [vmem:[%s1403_s3 + $0x8] sm:$0xff] (!%p373_p3)   ;;  %vm519_vm2 = vcmask (!%p373_p3), 519168   ;;  %vm595_vm3 = vcmask (!%p373_p3), 130048   ;;  %s1203_s25 = smov (!%p373_p3), 112  }
   0x8   : > { %1082 = vmatpush3.bf16.msra.mxu0 (!%p373_p3), %v1159_v0  ;;  %1085 = vmatprep.mubr.msk.bf16.mxu0 (!%p373_p3), %vm1202_vm0, %v1201_v1  ;;  %v1042_v9 = vld [vmem:[%s1406_s6] ss:$0 sm:$0xff] (!%p373_p3)  ;;  %v645_v32 = vshrl.u32 (!%p373_p3), %v644_v29, 7  ;;  %vm650_vm4 = vcmask (!%p373_p3), 64512   ;;  %vm671_vm5 = vcmask (!%p373_p3), 1043456   ;;  %s1205_s30 = smov (!%p373_p3), 80  }
   0x9   : > { %1083 = vmatprep.subr.bf16.mxu0 (!%p373_p3), %v1201_v1  ;;  %1093 = vmatprep.mubr.msk.bf16.mxu1 (!%p373_p3), %vm1202_vm0, %v1201_v1  ;;  %v1046_v20 = vld [vmem:[%s1404_s4] ss:$0 sm:$0xff] (!%p373_p3)  ;;  %vm837_vm6 = vcmask (!%p373_p3), 261248  }
   0xa   : > { %1090 = vmatpush3.bf16.msra.mxu1 (!%p373_p3), %v1161_v3  ;;  %v646_v34 = vsub.s32 (!%p373_p3), 0, %v645_v32 }
   0xb   : > { %1091 = vmatprep.subr.bf16.mxu1 (!%p373_p3), %v1201_v1 }
   0xc   : > { %1084 = vmatpush3.bf16.msra.mxu0 (!%p373_p3), %v1160_v2 }
   0xd   : > { %1097 = vmatprep.subr.bf16.mxu0 (!%p373_p3), %v1201_v1 }
   0xe   : > { %s1417_s17 = smov (!%p423_p4, %s1191_s17), 1  ;;  %1092 = vmatpush3.bf16.msra.mxu1 %v1162_v4 }
   0xf   : > { %s1307_s29 = sshll.u32 %s1417_s17, 3  ;;  %1103 = vmatprep.subr.bf16.mxu1 %v1201_v1  ;;  %s436_s28 = scalar_lea.vmem %s1402_s2, %s1417_s17 }
  0x10   : > { %s433_s13 = scalar_lea.vmem %s1401_s1, %s1307_s29  ;;  %s429_s16 = scalar_lea.vmem %s1400_s0, %s1307_s29  ;;  %v591_v30 = vld [vmem:[%s436_s28] sm:$0x1] }
  0x11   : > { %v449_v5 = vld [vmem:[%s433_s13] sm:$0xff]  ;;  %v592_v31 = vsub.f32 1.0, %v591_v30  ;;  %s1204_s17 = smov 96  }
  0x12   : > { %v450_v6 = vpack.c.bf16 %v449_v5, %v449_v5  ;;  %v1319_v7 = vld [vmem:[%s429_s16] sm:$0xff]  ;;  %s1206_s16 = smov 16  }
  0x13   : > { %v522_v8 = vpack.c.bf16 %v1319_v7, %v1319_v7  ;;  %v593_v33 = vmul.f32 -10000.0, %v592_v31 }
  0x14   : > { %1086 = vmatmul.mubr.msk.bf16.vlgmr.msra.gmra.mrb[0].mxu0 %vm474_vm1, %v450_v6 }
  0x15   : > { %1094 = vmatmul.mubr.msk.bf16.vlgmr.msra.gmra.mrb[0].mxu1 %vm474_vm1, %v522_v8  ;;  %1099 = vmatprep.mubr.msk.bf16.mxu0 %vm1202_vm0, %v1201_v1  ;;  %v647_v35 = vrot.slane %v593_v33, %v646_v34 }
  0x16   : > { %1105 = vmatprep.mubr.msk.bf16.mxu1 %vm1202_vm0, %v1201_v1 }
  0xe7   : > { %v512_v10 = vpop.f32.mrb[0].mxu0 }
  0xe8   : > { %v513_v11 = vadd.f32 %v1042_v9, %v512_v10  ;;  %v1087_v12 = vpop.f32.mrb[1].mxu0  ;;  %v584_v13 = vpop.f32.mrb[0].mxu1 }
  0xe9   : > { %v515_v14 = vpop.f32.mrb[2].mxu0  ;;  %v1095_v15 = vpop.f32.mrb[1].mxu1  ;;  %v585_v21 = vadd.f32 %v1046_v20, %v584_v13 }
  0xea   : > { %v518_v16 = vpack.c.bf16 %v513_v11, %v513_v11  ;;  %v1088_v17 = vpop.f32.mrb[3].mxu0  ;;  %v587_v18 = vpop.f32.mrb[2].mxu1  ;;  %v1165_v15 = vld [vmem:[%s1407_s7] sm:$0xff]  }
  0xeb   : > { %v1096_v19 = vpop.f32.mrb[3].mxu1  ;;  %v590_v25 = vpack.c.bf16 %v585_v21, %v585_v21 }
  0xec   : > { %520 = vst.msk [vmem:[#allocation2] sm:$0xf] %vm519_vm2, %v518_v16  ;;  %v1166_v16 = vld [vmem:[%s1407_s7 + $0x8] sm:$0xff]  }
  0xf3   : > { %v594_v22 = vld [vmem:[#allocation2] sm:$0xf] }
  0xf4   : > { %v1336_v23 = vld [vmem:[#allocation2] ss:$0 sps:$4 sm:$0xff]   ;;  %v600_v24 = vsel %vm595_vm3, %v594_v22, 0  ;;  %v1051_v50 = vcombine.low %v594_v22, %v594_v22 }
  0xf5   : > { %1098 = vmatpush3.bf16.xpose.msra.mxu0 %v600_v24  ;;  %723 = vrot.lane.b32.xlu0 %v1336_v23, %s1203_s25  ;;  %v1056_v24 = vld [vmem:[%s1408_s8] ss:$0 sm:$0xff] }
  0xf6   : > { %1109 = vmatprep.subr.bf16.mxu0 %v1201_v1 }
  0xf9   : > { %718 = vrot.lane.b32.xlu0 %v590_v25, %s1203_s25 }
  0xfc   : > { %1100 = vmatmul.mubr.msk.bf16.vlgmr.msra.gmra.mrb[4].mxu0 %vm595_vm3, %v590_v25 }
  0xfd   : > { %1111 = vmatprep.mubr.msk.bf16.mxu0 %vm1202_vm0, %v1201_v1 }
 0x167   : > { %v724_v26 = vpop.permute.xlu0 %723 }
 0x168   : > { %v729_v27 = vsel %vm595_vm3, %v724_v26, 0 }
 0x169   : > { %1110 = vmatpush3.bf16.xpose.msra.mxu0 %v729_v27 }
 0x16a   : > { %1121 = vmatprep.subr.bf16.mxu0 %v1201_v1 }
 0x16b   : > { %v719_v28 = vpop.permute.xlu0 %718 }
 0x170   : > { %1112 = vmatmul.mubr.msk.bf16.vlgmr.msra.gmra.mrb[8].mxu0 %vm595_vm3, %v719_v28 }
 0x171   : > { %1125 = vmatprep.mubr.msk.bf16.mxu0 %vm1202_vm0, %v1201_v1  ;;  %1122 = vmatpush3.bf16.msra.mxu0 %v1165_v15 }
 0x172   : > { %1123 = vmatprep.subr.bf16.mxu0 %v1201_v1 }
 0x175   : > { %1124 = vmatpush3.bf16.msra.mxu0 %v1166_v16 }
 0x1cf   : > { %v636_v36 = vpop.f32.mrb[4].mxu0 }
 0x1d0   : > { %v642_v37 = vmul.f32 0.25, %v636_v36  ;;  %v1101_v38 = vpop.f32.mrb[5].mxu0 }
 0x1d1   : > { %v639_v39 = vpop.f32.mrb[6].mxu0 }
 0x1d2   : > { %v1102_v40 = vpop.f32.mrb[7].mxu0  ;;  %v649_v41 = vadd.f32 %v647_v35, %v642_v37 }
 0x1d4   : > { %v651_v42 = vsel %vm650_vm4, %v649_v41, -inf }
 0x1d5   : > { %652 = vmax.xlane.f32.xlu1 %v651_v42 }
 0x243   : > { %v765_v43 = vpop.f32.mrb[8].mxu0 }
 0x244   : > { %v771_v44 = vmul.f32 0.25, %v765_v43  ;;  %v1113_v45 = vpop.f32.mrb[9].mxu0 }
 0x245   : > { %v768_v46 = vpop.f32.mrb[10].mxu0 }
 0x246   : > { %v1114_v47 = vpop.f32.mrb[11].mxu0  ;;  %v772_v48 = vadd.f32 %v771_v44, %v647_v35 }
 0x248   : > { %v773_v49 = vsel %vm650_vm4, %v772_v48, -inf }
 0x249   : > { %774 = vmax.xlane.f32.xlu1 %v773_v49 }
 0x25a   : > { %666 = vrot.lane.b32.xlu1 %v1051_v50, %s1204_s17  ;;  %s443_s17 = scalar_lea.vmem %s1411_s11, %s1307_s29 }
 0x262   : > { %v653_v51 = vpop.xlane.xlu1 %652 }
 0x263   : > { %v654_v52 = vsub.f32 %v649_v41, %v653_v51  ;;  %v1061_v41 = vld [vmem:[%s1410_s10] ss:$0 sm:$0xff] }
 0x265   : > { %v655_v53 = vmul.f32 1.442695, %v654_v52 }
 0x267   : > { %1167 = vpow2.f32 %v655_v53 }
 0x271   : > { %v1168_v54 = vpop.eup %1167 }
 0x272   : > { %v657_v55 = vsel %vm650_vm4, %v1168_v54, 0.0 }
 0x273   : > { %658 = vadd.xlane.f32.xlu0 %v657_v55 }
 0x2d6   : > { %v775_v56 = vpop.xlane.xlu1 %774 }
 0x2d7   : > { %v776_v57 = vsub.f32 %v772_v48, %v775_v56 }
 0x2d9   : > { %v777_v58 = vmul.f32 1.442695, %v776_v57 }
 0x2da   : > { %v667_v59 = vpop.permute.xlu1 %666 }
 0x2db   : > { %1169 = vpow2.f32 %v777_v58  ;;  %v673_v60 = vsel %vm671_vm5, %v667_v59, 0 }
 0x2dc   : > { %1104 = vmatpush3.bf16.msra.mxu1 %v673_v60 }
 0x2dd   : > { %1115 = vmatprep.subr.bf16.mxu1 %v1201_v1 }
 0x2e5   : > { %v1170_v61 = vpop.eup %1169 }
 0x2e6   : > { %v779_v62 = vsel %vm650_vm4, %v1170_v61, 0.0 }
 0x2e7   : > { %780 = vadd.xlane.f32.xlu1 %v779_v62 }
 0x2f8   : > { %785 = vrot.lane.b32.xlu1 %v1336_v23, %s1205_s30 }
 0x300   : > { %v659_v63 = vpop.xlane.xlu0 %658 }
 0x301   : > { %1171 = vrcp.f32 %v659_v63 }
 0x30b   : > { %v1172_v0 = vpop.eup %1171 }
 0x30c   : > { %v661_v2 = vmul.f32 %v1172_v0, %v1168_v54 }
 0x30e   : > { %v662_v3 = vpack.c.bf16 %v661_v2, %v661_v2 }
 0x310   : > { %1106 = vmatmul.mubr.msk.bf16.vlgmr.msra.gmra.mrb[4].mxu1 %vm650_vm4, %v662_v3 }
 0x311   : > { %1117 = vmatprep.mubr.msk.bf16.mxu1 %vm1202_vm0, %v1201_v1 }
 0x374   : > { %v781_v4 = vpop.xlane.xlu1 %780 }
 0x375   : > { %1173 = vrcp.f32 %v781_v4 }
 0x378   : > { %v786_v5 = vpop.permute.xlu1 %785 }
 0x379   : > { %v791_v6 = vsel %vm671_vm5, %v786_v5, 0 }
 0x37a   : > { %1116 = vmatpush3.bf16.msra.mxu1 %v791_v6 }
 0x37f   : > { %v1174_v8 = vpop.eup %1173 }
 0x380   : > { %v783_v9 = vmul.f32 %v1174_v8, %v1170_v61 }
 0x382   : > { %v784_v10 = vpack.c.bf16 %v783_v9, %v783_v9 }
 0x384   : > { %1118 = vmatmul.mubr.msk.bf16.vlgmr.msra.gmra.mrb[8].mxu1 %vm650_vm4, %v784_v10 }
 0x3e3   : > { %v709_v11 = vpop.f32.mrb[4].mxu1 }
 0x3e4   : > { %715 = vst.msk [vmem:[#allocation3] sm:$0xff] %vm595_vm3, %v709_v11  ;;  %v1107_v12 = vpop.f32.mrb[5].mxu1 }
 0x3e5   : > { %v712_v13 = vpop.f32.mrb[6].mxu1 }
 0x3e6   : > { %v1108_v14 = vpop.f32.mrb[7].mxu1 }
 0x457   : > { %v827_v17 = vpop.f32.mrb[8].mxu1 }
 0x458   : > { %834 = vrot.lane.b32.xlu1 %v827_v17, %s1206_s16  ;;  %v1119_v18 = vpop.f32.mrb[9].mxu1 }
 0x459   : > { %v830_v19 = vpop.f32.mrb[10].mxu1 }
 0x45a   : > { %v1120_v20 = vpop.f32.mrb[11].mxu1 }
 0x4ca   : > { %v835_v21 = vpop.permute.xlu1 %834 }
 0x4cb   : > { %838 = vst.msk [vmem:[#allocation3] sm:$0xff] %vm837_vm6, %v835_v21 }
 0x4d2   : > { %v839_v22 = vld [vmem:[#allocation3] sm:$0xff] }
 0x4d3   : > { %v840_v23 = vpack.c.bf16 %v839_v22, %v839_v22 }
 0x4d5   : > { %1126 = vmatmul.mubr.msk.bf16.vlgmr.msra.gmra.mrb[12].mxu0 %vm474_vm1, %v840_v23 }
 0x5a8   : > { %v901_v25 = vpop.f32.mrb[12].mxu0 }
 0x5a9   : > { %v902_v1 = vadd.f32 %v1056_v24, %v901_v25  ;;  %v1127_v26 = vpop.f32.mrb[13].mxu0 }
 0x5aa   : > { %v904_v27 = vpop.f32.mrb[14].mxu0 }
 0x5ab   : > { %v1128_v28 = vpop.f32.mrb[15].mxu0  ;;  %v907_v29 = vadd.f32 %v902_v1, %v1319_v7  ;;  %v1060_v7 = vld [vmem:[%s1409_s9] ss:$0 sm:$0xff] }
 0x5ad   : > { %v910_v30 = vsel %vm474_vm1, %v907_v29, 0.0 }
 0x5ae   : > { %911 = vadd.xlane.f32.xlu1 %v910_v30 }
 0x63b   : > { %v912_v31 = vpop.xlane.xlu1 %911 }
 0x63c   : > { %v914_v32 = vmul.f32 0.03125, %v912_v31 }
 0x63e   : > { %v915_v33 = vsub.f32 %v907_v29, %v914_v32 }
 0x640   : > { %v916_v34 = vmul.f32 %v915_v33, %v915_v33 }
 0x642   : > { %v917_v35 = vsel %vm474_vm1, %v916_v34, 0.0 }
 0x643   : > { %918 = vadd.xlane.f32.xlu0 %v917_v35 }
 0x6d0   : > { %v919_v36 = vpop.xlane.xlu0 %918 }
 0x6d1   : > { %v920_v37 = vmul.f32 0.03125, %v919_v36 }
 0x6d3   : > { %v921_v38 = vadd.f32 1e-12, %v920_v37 }
 0x6d5   : > { %1175 = vrsqrt.f32 %v921_v38 }
 0x6df   : > { %v1176_v39 = vpop.eup %1175 }
 0x6e0   : > { %v923_v40 = vmul.f32 %v1176_v39, %v915_v33 }
 0x6e2   : > { %v930_v42 = vmul.f32 %v1060_v7, %v923_v40 }
 0x6e4   : > { %v937_v43 = vadd.f32 %v1061_v41, %v930_v42 }
 0x6e6   : > { %938 = vst.msk [vmem:[%s443_s17] sm:$0xff] %vm474_vm1, %v937_v43 }
 0x6e7 PF: > { %s21_s19 = sadd.s32 1, %s1199_s19   ;;  %s1412_s17 = smov %s1195_s18 }
 0x6e8   : > { %p18_p5 = scmp.ge.s32.totalorder %s21_s19, 4   ;;  %s1413_s18 = smov %s1415_s20 }
 0x6ea   :  { %20 = sbr.rel (!%p18_p5) target bundleno = 2 (0x2), region = 104 }

</bundles_post_ra>
